<compile_context>
chip_gen: v7x
topology: tpu7x:2x2x1
jax: 0.10.0
libtpu: 0.0.40
codegen_flags: <defaults>
</compile_context>

<pallas_src>
import numpy as np
import jax
import jax.numpy as jnp
from jax import lax
from jax.experimental import pallas as pl
from jax.experimental.pallas import tpu as pltpu


# ----------------------------------------------------------------------------
# Host-side constant builders (all linear ops expressed as small matrices).
# ----------------------------------------------------------------------------
def bilinear_matrix(out_size, in_size):
    """Row-stochastic A (out, in) s.t. A @ v == F.interpolate(v, bilinear,
    align_corners=False, antialias=False) along one axis."""
    d = np.arange(out_size)
    src = (d + 0.5) * (in_size / out_size) - 0.5
    src = np.clip(src, 0.0, in_size - 1)
    i0 = np.floor(src).astype(np.int64)
    i1 = np.minimum(i0 + 1, in_size - 1)
    w1 = (src - i0).astype(np.float32)
    w0 = 1.0 - w1
    A = np.zeros((out_size, in_size), np.float32)
    A[d, i0] += w0
    A[d, i1] += w1
    return A


def adaptive_pool_matrix(out_size, in_size):
    """P (out, in) implementing nn.AdaptiveAvgPool1d semantics along one axis."""
    P = np.zeros((out_size, in_size), np.float32)
    for o in range(out_size):
        s = (o * in_size) // out_size
        e = -((-(o + 1) * in_size) // out_size)      # ceil((o+1)*in/out)
        P[o, s:e] = 1.0 / (e - s)
    return P


def width_resize_pad_matrices(Aw, C):
    """(C, W, C*(w+2)): per-channel matrix fusing the width resize, the horizontal
    zero padding and the channel-blocked conv column layout (col = c*(w+2)+1+j)."""
    w, W = Aw.shape
    wp = w + 2
    M = np.zeros((C, W, C * wp), np.float32)
    for c in range(C):
        M[c, :, c * wp + 1:c * wp + 1 + w] = Aw.T
    return M


def conv_band_matrices(w_oihw, width, pad_out):
    """Band matrices T (3, Cin*(width+2), Cout*ostride) for a 3x3, pad=1 conv.

    Input rows index the horizontally padded channel-blocked activation row
    layout (col = ci*(width+2) + j').  Output columns are co*ostride + off + j
    with (ostride, off) = (width+2, 1) when pad_out (output already carries the
    next conv's horizontal padding as exact-zero columns) else (width, 0)."""
    Cout, Cin, KH, KW = w_oihw.shape
    wp = width + 2
    ostride = wp if pad_out else width
    off = 1 if pad_out else 0
    T = np.zeros((KH, Cin * wp, Cout * ostride), np.float32)
    for dy in range(KH):
        for ci in range(Cin):
            for dx in range(KW):
                for j in range(width):
                    T[dy, ci * wp + j + dx, off + j::ostride] += w_oihw[:, ci, dy, dx]
    return T


def conv_bias_row(bias, width, pad_out):
    """Bias broadcast row matching conv_band_matrices' output column layout
    (zeros at the horizontal-pad columns so ReLU keeps them exactly zero)."""
    Cout = bias.shape[0]
    wp = width + 2
    ostride = wp if pad_out else width
    off = 1 if pad_out else 0
    r = np.zeros((1, Cout * ostride), np.float32)
    for co in range(Cout):
        r[0, co * ostride + off:co * ostride + off + width] = bias[co]
    return r


# ----------------------------------------------------------------------------
# The fused Pallas kernel: resize -> conv+ReLU -> conv -> adaptive avg pool.
# ----------------------------------------------------------------------------
def _make_fused_kernel(Bt, C, H, W, h, w, Cb, F, g):
    wp = w + 2

    def kernel(x_ref, ah_ref, wpad_ref, t1_ref, b1_ref, t2_ref, b2_ref,
               pwb_ref, ph_ref, o_ref, xp1_ref, xp2_ref):
        f32 = jnp.float32
        ah = ah_ref[...]                                           # (h, H)
        zrow1 = jnp.zeros((1, C * wp), f32)
        zrow2 = jnp.zeros((1, Cb * wp), f32)

        for bb in range(Bt):
            # 1) Bilinear resize, height-first per channel (lane-dense: K=H, N=W),
            #    immediately fused with {width resize + horizontal pad +
            #    channel-blocked conv layout} via the per-channel Wpad matrices.
            xp_int = jnp.zeros((h, C * wp), f32)
            for c in range(C):
                yc = jnp.dot(ah, x_ref[bb, c * H:(c + 1) * H, :],
                             preferred_element_type=f32)           # (h, W)
                xp_int = xp_int + jnp.dot(yc, wpad_ref[c],
                                          preferred_element_type=f32)
            # Single full-width interior store; zero ONLY the two vertical-pad
            # rows (unconditional: scratch is per-core under megacore sharding).
            xp1_ref[bb, 1:1 + h, :] = xp_int
            xp1_ref[bb, 0:1, :] = zrow1
            xp1_ref[bb, h + 1:h + 2, :] = zrow1

            # 2) Backbone conv3x3 + bias + ReLU: three band matmuls over dy.
            #    Output columns are already in conv-2's padded, channel-blocked
            #    layout (pad columns exactly zero through the ReLU).
            acc1 = jnp.zeros((h, Cb * wp), f32)
            for dy in range(3):
                acc1 = acc1 + jnp.dot(xp1_ref[bb, dy:dy + h, :], t1_ref[dy],
                                      preferred_element_type=f32)
            xp2_ref[bb, 1:1 + h, :] = jnp.maximum(acc1 + b1_ref[...], 0.0)
            xp2_ref[bb, 0:1, :] = zrow2
            xp2_ref[bb, h + 1:h + 2, :] = zrow2

            # 3) Head conv3x3 + bias: three band matmuls (N = F*w, lane-dense).
            acc2 = jnp.zeros((h, F * w), f32)
            for dy in range(3):
                acc2 = acc2 + jnp.dot(xp2_ref[bb, dy:dy + h, :], t2_ref[dy],
                                      preferred_element_type=f32)
            out2 = acc2 + b2_ref[...]                              # (h, F*w)

            # 4) Adaptive average pool: width then height, as matmuls.
            tmp = jnp.dot(out2, pwb_ref[...], preferred_element_type=f32)    # (h, F*g)
            pooled = jnp.dot(ph_ref[...], tmp, preferred_element_type=f32)   # (g, F*g)
            o_ref[bb] = pooled.astype(o_ref.dtype)

    return kernel


# ----------------------------------------------------------------------------
# ImageProcessor forward pass (Pallas).
# ----------------------------------------------------------------------------
class ImageProcessorPallas:
    def __init__(self, final_vector_size, grid_size, shrink_factor=16,
                 in_channels=3, backbone_channels=8, key=None,
                 max_images_per_step=8):
        if key is None:
            key = jax.random.PRNGKey(42)
        k0, k1, k2, k3 = jax.random.split(key, 4)
        self.F = final_vector_size
        self.g = grid_size
        self.sf = shrink_factor
        self.C = in_channels
        self.Cb = backbone_channels
        self.max_images_per_step = max_images_per_step
        # Deterministic synthetic weights in PyTorch OIHW layout.
        self.w1 = (np.asarray(jax.random.normal(
            k0, (backbone_channels, in_channels, 3, 3), jnp.float32)) * 0.1
        ).astype(np.float32)
        self.b1 = (np.asarray(jax.random.normal(
            k1, (backbone_channels,), jnp.float32)) * 0.01).astype(np.float32)
        self.w2 = (np.asarray(jax.random.normal(
            k2, (final_vector_size, backbone_channels, 3, 3), jnp.float32)) * 0.1
        ).astype(np.float32)
        self.b2 = (np.asarray(jax.random.normal(
            k3, (final_vector_size,), jnp.float32)) * 0.01).astype(np.float32)
        self._cache = {}

    def _constants(self, H, W):
        key = (H, W)
        if key in self._cache:
            return self._cache[key]
        C, Cb, F, g, sf = self.C, self.Cb, self.F, self.g, self.sf
        h, w = H // sf, W // sf
        Ah = bilinear_matrix(h, H)                               # (h, H)
        Aw = bilinear_matrix(w, W)                               # (w, W)
        Wpad = width_resize_pad_matrices(Aw, C)                  # (C, W, C*(w+2))
        T1 = conv_band_matrices(self.w1, w, pad_out=True)        # (3, C*(w+2), Cb*(w+2))
        T2 = conv_band_matrices(self.w2, w, pad_out=False)       # (3, Cb*(w+2), F*w)
        b1r = conv_bias_row(self.b1, w, pad_out=True)            # (1, Cb*(w+2))
        b2r = conv_bias_row(self.b2, w, pad_out=False)           # (1, F*w)
        Ph = adaptive_pool_matrix(g, h)                          # (g, h)
        Pw = adaptive_pool_matrix(g, w)                          # (g, w)
        PwB = np.kron(np.eye(F, dtype=np.float32), Pw.T).astype(np.float32)  # (F*w, F*g)
        consts = dict(h=h, w=w,
                      Ah=jnp.asarray(Ah), Wpad=jnp.asarray(Wpad),
                      T1=jnp.asarray(T1), b1r=jnp.asarray(b1r),
                      T2=jnp.asarray(T2), b2r=jnp.asarray(b2r),
                      PwB=jnp.asarray(PwB), Ph=jnp.asarray(Ph))
        self._cache[key] = consts
        return consts

    def __call__(self, x):
        """x: (B, C, H, W) float32 NCHW -> (B, F, g, g), matching the PyTorch module."""
        B, C, H, W = x.shape
        assert C == self.C
        cst = self._constants(H, W)
        h, w = cst["h"], cst["w"]
        Cb, F, g = self.Cb, self.F, self.g
        wp = w + 2

        # Images per grid step: amortizes per-step overhead; largest divisor of B
        # not exceeding max_images_per_step.
        Bt = max(d for d in range(1, min(B, self.max_images_per_step) + 1)
                 if B % d == 0)

        x2d = x.reshape(B, C * H, W)                             # free metadata reshape

        kernel = _make_fused_kernel(Bt, C, H, W, h, w, Cb, F, g)
        out = pl.pallas_call(
            kernel,
            out_shape=jax.ShapeDtypeStruct((B, g, F * g), jnp.float32),
            grid=(B // Bt,),
            in_specs=[
                pl.BlockSpec((Bt, C * H, W), lambda s: (s, 0, 0)),        # images
                pl.BlockSpec((h, H), lambda s: (0, 0)),                   # Ah (height resize)
                pl.BlockSpec((C, W, C * wp), lambda s: (0, 0, 0)),        # width resize+pad
                pl.BlockSpec((3, C * wp, Cb * wp), lambda s: (0, 0, 0)),  # conv1 bands
                pl.BlockSpec((1, Cb * wp), lambda s: (0, 0)),             # conv1 bias row
                pl.BlockSpec((3, Cb * wp, F * w), lambda s: (0, 0, 0)),   # conv2 bands
                pl.BlockSpec((1, F * w), lambda s: (0, 0)),               # conv2 bias row
                pl.BlockSpec((F * w, F * g), lambda s: (0, 0)),           # width pool
                pl.BlockSpec((g, h), lambda s: (0, 0)),                   # height pool
            ],
            out_specs=pl.BlockSpec((Bt, g, F * g), lambda s: (s, 0, 0)),
            scratch_shapes=[
                pltpu.VMEM((Bt, h + 2, C * wp), jnp.float32),             # padded resize
                pltpu.VMEM((Bt, h + 2, Cb * wp), jnp.float32),            # padded features
            ],
            compiler_params=pltpu.CompilerParams(
                dimension_semantics=("parallel",),
                vmem_limit_bytes=32 * 1024 * 1024),
        )(x2d, cst["Ah"], cst["Wpad"], cst["T1"], cst["b1r"],
          cst["T2"], cst["b2r"], cst["PwB"], cst["Ph"])

        # (B, g, F*g) with channel-blocked columns (f, gj) -> NCHW (B, F, g, g).
        return out.reshape(B, g, F, g).transpose(0, 2, 1, 3)


# ----------------------------------------------------------------------------
# Pure-JAX reference (independent conv path) for a correctness sanity check.
# ----------------------------------------------------------------------------
def reference_forward(x, model):
    B, C, H, W = x.shape
    h, w = H // model.sf, W // model.sf
    hp = jax.lax.Precision.HIGHEST
    Ah = jnp.asarray(bilinear_matrix(h, H))
    Aw = jnp.asarray(bilinear_matrix(w, W))
    xs = jnp.einsum('ip,jq,bcpq->bcij', Ah, Aw, x, precision=hp)
    dn = ('NCHW', 'OIHW', 'NCHW')
    w1, b1 = jnp.asarray(model.w1), jnp.asarray(model.b1)
    w2, b2 = jnp.asarray(model.w2), jnp.asarray(model.b2)
    f = lax.conv_general_dilated(xs, w1, (1, 1), ((1, 1), (1, 1)),
                                 dimension_numbers=dn, precision=hp)
    f = jnp.maximum(f + b1[None, :, None, None], 0.0)
    v = lax.conv_general_dilated(f, w2, (1, 1), ((1, 1), (1, 1)),
                                 dimension_numbers=dn, precision=hp)
    v = v + b2[None, :, None, None]
    Ph = jnp.asarray(adaptive_pool_matrix(model.g, h))
    Pw = jnp.asarray(adaptive_pool_matrix(model.g, w))
    return jnp.einsum('ui,vj,ncij->ncuv', Ph, Pw, v, precision=hp)


if __name__ == "__main__":
    key = jax.random.PRNGKey(0)
    kx, kp = jax.random.split(key)
    # batch=4 (2 images per grid step -> grid=(2,)), channels=3, 128x128 image,
    # shrink=16 -> 8x8 features, final_vector_size=16, grid_size=4 -> (4, 16, 4, 4).
    x = jax.random.normal(kx, (4, 3, 128, 128), jnp.float32)
    model = ImageProcessorPallas(final_vector_size=16, grid_size=4,
                                 shrink_factor=16, key=kp, max_images_per_step=2)
    out = jax.block_until_ready(model(x))
    assert out.shape == (4, 16, 4, 4), out.shape
    assert bool(jnp.all(jnp.isfinite(out)))
    ref = jax.block_until_ready(reference_forward(x, model))
    # NOTE: tolerance covers the TPU MXU's reduced-precision f32 matmul passes.
    np.testing.assert_allclose(np.asarray(out), np.asarray(ref), rtol=2e-2, atol=2e-2)
    print("KERNEL_OK")
</pallas_src>

<mosaic_0001>
module attributes {stable_mosaic.version = 11 : i64} {
  func.func @kernel(%arg0: i32, %arg1: memref<2x384x128xf32, #tpu.memory_space<vmem>>, %arg2: memref<8x128xf32, #tpu.memory_space<vmem>>, %arg3: memref<3x128x30xf32, #tpu.memory_space<vmem>>, %arg4: memref<3x30x80xf32, #tpu.memory_space<vmem>>, %arg5: memref<1x80xf32, #tpu.memory_space<vmem>>, %arg6: memref<3x80x128xf32, #tpu.memory_space<vmem>>, %arg7: memref<1x128xf32, #tpu.memory_space<vmem>>, %arg8: memref<128x64xf32, #tpu.memory_space<vmem>>, %arg9: memref<4x8xf32, #tpu.memory_space<vmem>>, %arg10: memref<2x4x64xf32, #tpu.memory_space<vmem>>, %arg11: memref<2x10x30xf32, #tpu.memory_space<vmem>>, %arg12: memref<2x10x80xf32, #tpu.memory_space<vmem>>) attributes {dimension_semantics = [#tpu.dimension_semantics<parallel>], iteration_bounds = array<i64: 2>, scalar_prefetch = 0 : i64, scratch_operands = 2 : i64, tpu.core_type = #tpu.core_type<tc>, window_params = [{transform_indices = @transform_0, window_bounds = array<i64: 2, 384, 128>}, {pipeline_mode = #tpu.pipeline_mode<synchronous>, transform_indices = @transform_1, window_bounds = array<i64: 8, 128>}, {pipeline_mode = #tpu.pipeline_mode<synchronous>, transform_indices = @transform_2, window_bounds = array<i64: 3, 128, 30>}, {pipeline_mode = #tpu.pipeline_mode<synchronous>, transform_indices = @transform_3, window_bounds = array<i64: 3, 30, 80>}, {pipeline_mode = #tpu.pipeline_mode<synchronous>, transform_indices = @transform_4, window_bounds = array<i64: 1, 80>}, {pipeline_mode = #tpu.pipeline_mode<synchronous>, transform_indices = @transform_5, window_bounds = array<i64: 3, 80, 128>}, {pipeline_mode = #tpu.pipeline_mode<synchronous>, transform_indices = @transform_6, window_bounds = array<i64: 1, 128>}, {pipeline_mode = #tpu.pipeline_mode<synchronous>, transform_indices = @transform_7, window_bounds = array<i64: 128, 64>}, {pipeline_mode = #tpu.pipeline_mode<synchronous>, transform_indices = @transform_8, window_bounds = array<i64: 4, 8>}, {transform_indices = @transform_9, window_bounds = array<i64: 2, 4, 64>}]} {
    %c0 = arith.constant 0 : index
    %c0_0 = arith.constant 0 : index
    %0 = vector.load %arg2[%c0, %c0_0] : memref<8x128xf32, #tpu.memory_space<vmem>>, vector<8x128xf32>
    %cst = arith.constant 0.000000e+00 : f32
    %1 = vector.broadcast %cst : f32 to vector<1x30xf32>
    %cst_1 = arith.constant 0.000000e+00 : f32
    %2 = vector.broadcast %cst_1 : f32 to vector<1x80xf32>
    %cst_2 = arith.constant 0.000000e+00 : f32
    %3 = vector.broadcast %cst_2 : f32 to vector<8x30xf32>
    %c0_3 = arith.constant 0 : index
    %c0_4 = arith.constant 0 : index
    %c0_5 = arith.constant 0 : index
    %4 = vector.load %arg1[%c0_3, %c0_4, %c0_5] : memref<2x384x128xf32, #tpu.memory_space<vmem>>, vector<1x128x128xf32>
    %5 = vector.shape_cast %4 : vector<1x128x128xf32> to vector<128x128xf32>
    %cst_6 = arith.constant dense<0.000000e+00> : vector<8x128xf32>
    %6 = tpu.matmul %0, %5, %cst_6 {dimension_numbers = #tpu.dot_dimension_numbers<[1], [0], [0], [1], [0, 0, 1, 1], [], []>} : vector<8x128xf32>, vector<128x128xf32>, vector<8x128xf32> -> vector<8x128xf32>
    %c0_7 = arith.constant 0 : index
    %c0_8 = arith.constant 0 : index
    %c0_9 = arith.constant 0 : index
    %7 = vector.load %arg3[%c0_7, %c0_8, %c0_9] : memref<3x128x30xf32, #tpu.memory_space<vmem>>, vector<1x128x30xf32>
    %8 = vector.shape_cast %7 : vector<1x128x30xf32> to vector<128x30xf32>
    %cst_10 = arith.constant dense<0.000000e+00> : vector<8x30xf32>
    %9 = tpu.matmul %6, %8, %cst_10 {dimension_numbers = #tpu.dot_dimension_numbers<[1], [0], [0], [1], [0, 0, 1, 1], [], []>} : vector<8x128xf32>, vector<128x30xf32>, vector<8x30xf32> -> vector<8x30xf32>
    %10 = arith.addf %3, %9 : vector<8x30xf32>
    %c0_11 = arith.constant 0 : index
    %c128 = arith.constant 128 : index
    %c0_12 = arith.constant 0 : index
    %11 = vector.load %arg1[%c0_11, %c128, %c0_12] : memref<2x384x128xf32, #tpu.memory_space<vmem>>, vector<1x128x128xf32>
    %12 = vector.shape_cast %11 : vector<1x128x128xf32> to vector<128x128xf32>
    %cst_13 = arith.constant dense<0.000000e+00> : vector<8x128xf32>
    %13 = tpu.matmul %0, %12, %cst_13 {dimension_numbers = #tpu.dot_dimension_numbers<[1], [0], [0], [1], [0, 0, 1, 1], [], []>} : vector<8x128xf32>, vector<128x128xf32>, vector<8x128xf32> -> vector<8x128xf32>
    %c1 = arith.constant 1 : index
    %c0_14 = arith.constant 0 : index
    %c0_15 = arith.constant 0 : index
    %14 = vector.load %arg3[%c1, %c0_14, %c0_15] : memref<3x128x30xf32, #tpu.memory_space<vmem>>, vector<1x128x30xf32>
    %15 = vector.shape_cast %14 : vector<1x128x30xf32> to vector<128x30xf32>
    %cst_16 = arith.constant dense<0.000000e+00> : vector<8x30xf32>
    %16 = tpu.matmul %13, %15, %cst_16 {dimension_numbers = #tpu.dot_dimension_numbers<[1], [0], [0], [1], [0, 0, 1, 1], [], []>} : vector<8x128xf32>, vector<128x30xf32>, vector<8x30xf32> -> vector<8x30xf32>
    %17 = arith.addf %10, %16 : vector<8x30xf32>
    %c0_17 = arith.constant 0 : index
    %c256 = arith.constant 256 : index
    %c0_18 = arith.constant 0 : index
    %18 = vector.load %arg1[%c0_17, %c256, %c0_18] : memref<2x384x128xf32, #tpu.memory_space<vmem>>, vector<1x128x128xf32>
    %19 = vector.shape_cast %18 : vector<1x128x128xf32> to vector<128x128xf32>
    %cst_19 = arith.constant dense<0.000000e+00> : vector<8x128xf32>
    %20 = tpu.matmul %0, %19, %cst_19 {dimension_numbers = #tpu.dot_dimension_numbers<[1], [0], [0], [1], [0, 0, 1, 1], [], []>} : vector<8x128xf32>, vector<128x128xf32>, vector<8x128xf32> -> vector<8x128xf32>
    %c2 = arith.constant 2 : index
    %c0_20 = arith.constant 0 : index
    %c0_21 = arith.constant 0 : index
    %21 = vector.load %arg3[%c2, %c0_20, %c0_21] : memref<3x128x30xf32, #tpu.memory_space<vmem>>, vector<1x128x30xf32>
    %22 = vector.shape_cast %21 : vector<1x128x30xf32> to vector<128x30xf32>
    %cst_22 = arith.constant dense<0.000000e+00> : vector<8x30xf32>
    %23 = tpu.matmul %20, %22, %cst_22 {dimension_numbers = #tpu.dot_dimension_numbers<[1], [0], [0], [1], [0, 0, 1, 1], [], []>} : vector<8x128xf32>, vector<128x30xf32>, vector<8x30xf32> -> vector<8x30xf32>
    %24 = arith.addf %17, %23 : vector<8x30xf32>
    %c0_23 = arith.constant 0 : index
    %c1_24 = arith.constant 1 : index
    %c0_25 = arith.constant 0 : index
    %25 = vector.load %arg11[%c0_23, %c1_24, %c0_25] : memref<2x10x30xf32, #tpu.memory_space<vmem>>, vector<1x8x30xf32>
    %26 = vector.shape_cast %25 : vector<1x8x30xf32> to vector<8x30xf32>
    %27 = vector.shape_cast %24 : vector<8x30xf32> to vector<1x8x30xf32>
    tpu.vector_store %arg11[%c0_23, %c1_24, %c0_25], %27 {strides = array<i32>} : memref<2x10x30xf32, #tpu.memory_space<vmem>>, vector<1x8x30xf32>,
    %c0_26 = arith.constant 0 : index
    %c0_27 = arith.constant 0 : index
    %c0_28 = arith.constant 0 : index
    %28 = vector.load %arg11[%c0_26, %c0_27, %c0_28] : memref<2x10x30xf32, #tpu.memory_space<vmem>>, vector<1x1x30xf32>
    %29 = vector.shape_cast %28 : vector<1x1x30xf32> to vector<1x30xf32>
    %30 = vector.shape_cast %1 : vector<1x30xf32> to vector<1x1x30xf32>
    tpu.vector_store %arg11[%c0_26, %c0_27, %c0_28], %30 {strides = array<i32>} : memref<2x10x30xf32, #tpu.memory_space<vmem>>, vector<1x1x30xf32>,
    %c0_29 = arith.constant 0 : index
    %c9 = arith.constant 9 : index
    %c0_30 = arith.constant 0 : index
    %31 = vector.load %arg11[%c0_29, %c9, %c0_30] : memref<2x10x30xf32, #tpu.memory_space<vmem>>, vector<1x1x30xf32>
    %32 = vector.shape_cast %31 : vector<1x1x30xf32> to vector<1x30xf32>
    %33 = vector.shape_cast %1 : vector<1x30xf32> to vector<1x1x30xf32>
    tpu.vector_store %arg11[%c0_29, %c9, %c0_30], %33 {strides = array<i32>} : memref<2x10x30xf32, #tpu.memory_space<vmem>>, vector<1x1x30xf32>,
    %cst_31 = arith.constant 0.000000e+00 : f32
    %34 = vector.broadcast %cst_31 : f32 to vector<8x80xf32>
    %c0_32 = arith.constant 0 : index
    %c0_33 = arith.constant 0 : index
    %c0_34 = arith.constant 0 : index
    %35 = vector.load %arg11[%c0_32, %c0_33, %c0_34] : memref<2x10x30xf32, #tpu.memory_space<vmem>>, vector<1x8x30xf32>
    %36 = vector.shape_cast %35 : vector<1x8x30xf32> to vector<8x30xf32>
    %c0_35 = arith.constant 0 : index
    %c0_36 = arith.constant 0 : index
    %c0_37 = arith.constant 0 : index
    %37 = vector.load %arg4[%c0_35, %c0_36, %c0_37] : memref<3x30x80xf32, #tpu.memory_space<vmem>>, vector<1x30x80xf32>
    %38 = vector.shape_cast %37 : vector<1x30x80xf32> to vector<30x80xf32>
    %cst_38 = arith.constant dense<0.000000e+00> : vector<8x80xf32>
    %39 = tpu.matmul %36, %38, %cst_38 {dimension_numbers = #tpu.dot_dimension_numbers<[1], [0], [0], [1], [0, 0, 1, 1], [], []>} : vector<8x30xf32>, vector<30x80xf32>, vector<8x80xf32> -> vector<8x80xf32>
    %40 = arith.addf %34, %39 : vector<8x80xf32>
    %c0_39 = arith.constant 0 : index
    %c1_40 = arith.constant 1 : index
    %c0_41 = arith.constant 0 : index
    %41 = vector.load %arg11[%c0_39, %c1_40, %c0_41] : memref<2x10x30xf32, #tpu.memory_space<vmem>>, vector<1x8x30xf32>
    %42 = vector.shape_cast %41 : vector<1x8x30xf32> to vector<8x30xf32>
    %c1_42 = arith.constant 1 : index
    %c0_43 = arith.constant 0 : index
    %c0_44 = arith.constant 0 : index
    %43 = vector.load %arg4[%c1_42, %c0_43, %c0_44] : memref<3x30x80xf32, #tpu.memory_space<vmem>>, vector<1x30x80xf32>
    %44 = vector.shape_cast %43 : vector<1x30x80xf32> to vector<30x80xf32>
    %cst_45 = arith.constant dense<0.000000e+00> : vector<8x80xf32>
    %45 = tpu.matmul %42, %44, %cst_45 {dimension_numbers = #tpu.dot_dimension_numbers<[1], [0], [0], [1], [0, 0, 1, 1], [], []>} : vector<8x30xf32>, vector<30x80xf32>, vector<8x80xf32> -> vector<8x80xf32>
    %46 = arith.addf %40, %45 : vector<8x80xf32>
    %c0_46 = arith.constant 0 : index
    %c2_47 = arith.constant 2 : index
    %c0_48 = arith.constant 0 : index
    %47 = vector.load %arg11[%c0_46, %c2_47, %c0_48] : memref<2x10x30xf32, #tpu.memory_space<vmem>>, vector<1x8x30xf32>
    %48 = vector.shape_cast %47 : vector<1x8x30xf32> to vector<8x30xf32>
    %c2_49 = arith.constant 2 : index
    %c0_50 = arith.constant 0 : index
    %c0_51 = arith.constant 0 : index
    %49 = vector.load %arg4[%c2_49, %c0_50, %c0_51] : memref<3x30x80xf32, #tpu.memory_space<vmem>>, vector<1x30x80xf32>
    %50 = vector.shape_cast %49 : vector<1x30x80xf32> to vector<30x80xf32>
    %cst_52 = arith.constant dense<0.000000e+00> : vector<8x80xf32>
    %51 = tpu.matmul %48, %50, %cst_52 {dimension_numbers = #tpu.dot_dimension_numbers<[1], [0], [0], [1], [0, 0, 1, 1], [], []>} : vector<8x30xf32>, vector<30x80xf32>, vector<8x80xf32> -> vector<8x80xf32>
    %52 = arith.addf %46, %51 : vector<8x80xf32>
    %c0_53 = arith.constant 0 : index
    %c0_54 = arith.constant 0 : index
    %53 = vector.load %arg5[%c0_53, %c0_54] : memref<1x80xf32, #tpu.memory_space<vmem>>, vector<1x80xf32>
    %54 = vector.broadcast %53 : vector<1x80xf32> to vector<8x80xf32>
    %55 = arith.addf %52, %54 : vector<8x80xf32>
    %cst_55 = arith.constant 0.000000e+00 : f32
    %56 = vector.broadcast %cst_55 : f32 to vector<8x80xf32>
    %57 = arith.maximumf %55, %56 : vector<8x80xf32>
    %c0_56 = arith.constant 0 : index
    %c1_57 = arith.constant 1 : index
    %c0_58 = arith.constant 0 : index
    %58 = vector.load %arg12[%c0_56, %c1_57, %c0_58] : memref<2x10x80xf32, #tpu.memory_space<vmem>>, vector<1x8x80xf32>
    %59 = vector.shape_cast %58 : vector<1x8x80xf32> to vector<8x80xf32>
    %60 = vector.shape_cast %57 : vector<8x80xf32> to vector<1x8x80xf32>
    tpu.vector_store %arg12[%c0_56, %c1_57, %c0_58], %60 {strides = array<i32>} : memref<2x10x80xf32, #tpu.memory_space<vmem>>, vector<1x8x80xf32>,
    %c0_59 = arith.constant 0 : index
    %c0_60 = arith.constant 0 : index
    %c0_61 = arith.constant 0 : index
    %61 = vector.load %arg12[%c0_59, %c0_60, %c0_61] : memref<2x10x80xf32, #tpu.memory_space<vmem>>, vector<1x1x80xf32>
    %62 = vector.shape_cast %61 : vector<1x1x80xf32> to vector<1x80xf32>
    %63 = vector.shape_cast %2 : vector<1x80xf32> to vector<1x1x80xf32>
    tpu.vector_store %arg12[%c0_59, %c0_60, %c0_61], %63 {strides = array<i32>} : memref<2x10x80xf32, #tpu.memory_space<vmem>>, vector<1x1x80xf32>,
    %c0_62 = arith.constant 0 : index
    %c9_63 = arith.constant 9 : index
    %c0_64 = arith.constant 0 : index
    %64 = vector.load %arg12[%c0_62, %c9_63, %c0_64] : memref<2x10x80xf32, #tpu.memory_space<vmem>>, vector<1x1x80xf32>
    %65 = vector.shape_cast %64 : vector<1x1x80xf32> to vector<1x80xf32>
    %66 = vector.shape_cast %2 : vector<1x80xf32> to vector<1x1x80xf32>
    tpu.vector_store %arg12[%c0_62, %c9_63, %c0_64], %66 {strides = array<i32>} : memref<2x10x80xf32, #tpu.memory_space<vmem>>, vector<1x1x80xf32>,
    %cst_65 = arith.constant 0.000000e+00 : f32
    %67 = vector.broadcast %cst_65 : f32 to vector<8x128xf32>
    %c0_66 = arith.constant 0 : index
    %c0_67 = arith.constant 0 : index
    %c0_68 = arith.constant 0 : index
    %68 = vector.load %arg12[%c0_66, %c0_67, %c0_68] : memref<2x10x80xf32, #tpu.memory_space<vmem>>, vector<1x8x80xf32>
    %69 = vector.shape_cast %68 : vector<1x8x80xf32> to vector<8x80xf32>
    %c0_69 = arith.constant 0 : index
    %c0_70 = arith.constant 0 : index
    %c0_71 = arith.constant 0 : index
    %70 = vector.load %arg6[%c0_69, %c0_70, %c0_71] : memref<3x80x128xf32, #tpu.memory_space<vmem>>, vector<1x80x128xf32>
    %71 = vector.shape_cast %70 : vector<1x80x128xf32> to vector<80x128xf32>
    %cst_72 = arith.constant dense<0.000000e+00> : vector<8x128xf32>
    %72 = tpu.matmul %69, %71, %cst_72 {dimension_numbers = #tpu.dot_dimension_numbers<[1], [0], [0], [1], [0, 0, 1, 1], [], []>} : vector<8x80xf32>, vector<80x128xf32>, vector<8x128xf32> -> vector<8x128xf32>
    %73 = arith.addf %67, %72 : vector<8x128xf32>
    %c0_73 = arith.constant 0 : index
    %c1_74 = arith.constant 1 : index
    %c0_75 = arith.constant 0 : index
    %74 = vector.load %arg12[%c0_73, %c1_74, %c0_75] : memref<2x10x80xf32, #tpu.memory_space<vmem>>, vector<1x8x80xf32>
    %75 = vector.shape_cast %74 : vector<1x8x80xf32> to vector<8x80xf32>
    %c1_76 = arith.constant 1 : index
    %c0_77 = arith.constant 0 : index
    %c0_78 = arith.constant 0 : index
    %76 = vector.load %arg6[%c1_76, %c0_77, %c0_78] : memref<3x80x128xf32, #tpu.memory_space<vmem>>, vector<1x80x128xf32>
    %77 = vector.shape_cast %76 : vector<1x80x128xf32> to vector<80x128xf32>
    %cst_79 = arith.constant dense<0.000000e+00> : vector<8x128xf32>
    %78 = tpu.matmul %75, %77, %cst_79 {dimension_numbers = #tpu.dot_dimension_numbers<[1], [0], [0], [1], [0, 0, 1, 1], [], []>} : vector<8x80xf32>, vector<80x128xf32>, vector<8x128xf32> -> vector<8x128xf32>
    %79 = arith.addf %73, %78 : vector<8x128xf32>
    %c0_80 = arith.constant 0 : index
    %c2_81 = arith.constant 2 : index
    %c0_82 = arith.constant 0 : index
    %80 = vector.load %arg12[%c0_80, %c2_81, %c0_82] : memref<2x10x80xf32, #tpu.memory_space<vmem>>, vector<1x8x80xf32>
    %81 = vector.shape_cast %80 : vector<1x8x80xf32> to vector<8x80xf32>
    %c2_83 = arith.constant 2 : index
    %c0_84 = arith.constant 0 : index
    %c0_85 = arith.constant 0 : index
    %82 = vector.load %arg6[%c2_83, %c0_84, %c0_85] : memref<3x80x128xf32, #tpu.memory_space<vmem>>, vector<1x80x128xf32>
    %83 = vector.shape_cast %82 : vector<1x80x128xf32> to vector<80x128xf32>
    %cst_86 = arith.constant dense<0.000000e+00> : vector<8x128xf32>
    %84 = tpu.matmul %81, %83, %cst_86 {dimension_numbers = #tpu.dot_dimension_numbers<[1], [0], [0], [1], [0, 0, 1, 1], [], []>} : vector<8x80xf32>, vector<80x128xf32>, vector<8x128xf32> -> vector<8x128xf32>
    %85 = arith.addf %79, %84 : vector<8x128xf32>
    %c0_87 = arith.constant 0 : index
    %c0_88 = arith.constant 0 : index
    %86 = vector.load %arg7[%c0_87, %c0_88] : memref<1x128xf32, #tpu.memory_space<vmem>>, vector<1x128xf32>
    %87 = vector.broadcast %86 : vector<1x128xf32> to vector<8x128xf32>
    %88 = arith.addf %85, %87 : vector<8x128xf32>
    %c0_89 = arith.constant 0 : index
    %c0_90 = arith.constant 0 : index
    %89 = vector.load %arg8[%c0_89, %c0_90] : memref<128x64xf32, #tpu.memory_space<vmem>>, vector<128x64xf32>
    %cst_91 = arith.constant dense<0.000000e+00> : vector<8x64xf32>
    %90 = tpu.matmul %88, %89, %cst_91 {dimension_numbers = #tpu.dot_dimension_numbers<[1], [0], [0], [1], [0, 0, 1, 1], [], []>} : vector<8x128xf32>, vector<128x64xf32>, vector<8x64xf32> -> vector<8x64xf32>
    %c0_92 = arith.constant 0 : index
    %c0_93 = arith.constant 0 : index
    %91 = vector.load %arg9[%c0_92, %c0_93] : memref<4x8xf32, #tpu.memory_space<vmem>>, vector<4x8xf32>
    %cst_94 = arith.constant dense<0.000000e+00> : vector<4x64xf32>
    %92 = tpu.matmul %91, %90, %cst_94 {dimension_numbers = #tpu.dot_dimension_numbers<[1], [0], [0], [1], [0, 0, 1, 1], [], []>} : vector<4x8xf32>, vector<8x64xf32>, vector<4x64xf32> -> vector<4x64xf32>
    %c0_95 = arith.constant 0 : index
    %c0_96 = arith.constant 0 : index
    %c0_97 = arith.constant 0 : index
    %93 = vector.load %arg10[%c0_95, %c0_96, %c0_97] : memref<2x4x64xf32, #tpu.memory_space<vmem>>, vector<1x4x64xf32>
    %94 = vector.shape_cast %93 : vector<1x4x64xf32> to vector<4x64xf32>
    %95 = vector.shape_cast %92 : vector<4x64xf32> to vector<1x4x64xf32>
    tpu.vector_store %arg10[%c0_95, %c0_96, %c0_97], %95 {strides = array<i32>} : memref<2x4x64xf32, #tpu.memory_space<vmem>>, vector<1x4x64xf32>,
    %cst_98 = arith.constant 0.000000e+00 : f32
    %96 = vector.broadcast %cst_98 : f32 to vector<8x30xf32>
    %c1_99 = arith.constant 1 : index
    %c0_100 = arith.constant 0 : index
    %c0_101 = arith.constant 0 : index
    %97 = vector.load %arg1[%c1_99, %c0_100, %c0_101] : memref<2x384x128xf32, #tpu.memory_space<vmem>>, vector<1x128x128xf32>
    %98 = vector.shape_cast %97 : vector<1x128x128xf32> to vector<128x128xf32>
    %cst_102 = arith.constant dense<0.000000e+00> : vector<8x128xf32>
    %99 = tpu.matmul %0, %98, %cst_102 {dimension_numbers = #tpu.dot_dimension_numbers<[1], [0], [0], [1], [0, 0, 1, 1], [], []>} : vector<8x128xf32>, vector<128x128xf32>, vector<8x128xf32> -> vector<8x128xf32>
    %c0_103 = arith.constant 0 : index
    %c0_104 = arith.constant 0 : index
    %c0_105 = arith.constant 0 : index
    %100 = vector.load %arg3[%c0_103, %c0_104, %c0_105] : memref<3x128x30xf32, #tpu.memory_space<vmem>>, vector<1x128x30xf32>
    %101 = vector.shape_cast %100 : vector<1x128x30xf32> to vector<128x30xf32>
    %cst_106 = arith.constant dense<0.000000e+00> : vector<8x30xf32>
    %102 = tpu.matmul %99, %101, %cst_106 {dimension_numbers = #tpu.dot_dimension_numbers<[1], [0], [0], [1], [0, 0, 1, 1], [], []>} : vector<8x128xf32>, vector<128x30xf32>, vector<8x30xf32> -> vector<8x30xf32>
    %103 = arith.addf %96, %102 : vector<8x30xf32>
    %c1_107 = arith.constant 1 : index
    %c128_108 = arith.constant 128 : index
    %c0_109 = arith.constant 0 : index
    %104 = vector.load %arg1[%c1_107, %c128_108, %c0_109] : memref<2x384x128xf32, #tpu.memory_space<vmem>>, vector<1x128x128xf32>
    %105 = vector.shape_cast %104 : vector<1x128x128xf32> to vector<128x128xf32>
    %cst_110 = arith.constant dense<0.000000e+00> : vector<8x128xf32>
    %106 = tpu.matmul %0, %105, %cst_110 {dimension_numbers = #tpu.dot_dimension_numbers<[1], [0], [0], [1], [0, 0, 1, 1], [], []>} : vector<8x128xf32>, vector<128x128xf32>, vector<8x128xf32> -> vector<8x128xf32>
    %c1_111 = arith.constant 1 : index
    %c0_112 = arith.constant 0 : index
    %c0_113 = arith.constant 0 : index
    %107 = vector.load %arg3[%c1_111, %c0_112, %c0_113] : memref<3x128x30xf32, #tpu.memory_space<vmem>>, vector<1x128x30xf32>
    %108 = vector.shape_cast %107 : vector<1x128x30xf32> to vector<128x30xf32>
    %cst_114 = arith.constant dense<0.000000e+00> : vector<8x30xf32>
    %109 = tpu.matmul %106, %108, %cst_114 {dimension_numbers = #tpu.dot_dimension_numbers<[1], [0], [0], [1], [0, 0, 1, 1], [], []>} : vector<8x128xf32>, vector<128x30xf32>, vector<8x30xf32> -> vector<8x30xf32>
    %110 = arith.addf %103, %109 : vector<8x30xf32>
    %c1_115 = arith.constant 1 : index
    %c256_116 = arith.constant 256 : index
    %c0_117 = arith.constant 0 : index
    %111 = vector.load %arg1[%c1_115, %c256_116, %c0_117] : memref<2x384x128xf32, #tpu.memory_space<vmem>>, vector<1x128x128xf32>
    %112 = vector.shape_cast %111 : vector<1x128x128xf32> to vector<128x128xf32>
    %cst_118 = arith.constant dense<0.000000e+00> : vector<8x128xf32>
    %113 = tpu.matmul %0, %112, %cst_118 {dimension_numbers = #tpu.dot_dimension_numbers<[1], [0], [0], [1], [0, 0, 1, 1], [], []>} : vector<8x128xf32>, vector<128x128xf32>, vector<8x128xf32> -> vector<8x128xf32>
    %c2_119 = arith.constant 2 : index
    %c0_120 = arith.constant 0 : index
    %c0_121 = arith.constant 0 : index
    %114 = vector.load %arg3[%c2_119, %c0_120, %c0_121] : memref<3x128x30xf32, #tpu.memory_space<vmem>>, vector<1x128x30xf32>
    %115 = vector.shape_cast %114 : vector<1x128x30xf32> to vector<128x30xf32>
    %cst_122 = arith.constant dense<0.000000e+00> : vector<8x30xf32>
    %116 = tpu.matmul %113, %115, %cst_122 {dimension_numbers = #tpu.dot_dimension_numbers<[1], [0], [0], [1], [0, 0, 1, 1], [], []>} : vector<8x128xf32>, vector<128x30xf32>, vector<8x30xf32> -> vector<8x30xf32>
    %117 = arith.addf %110, %116 : vector<8x30xf32>
    %c1_123 = arith.constant 1 : index
    %c1_124 = arith.constant 1 : index
    %c0_125 = arith.constant 0 : index
    %118 = vector.load %arg11[%c1_123, %c1_124, %c0_125] : memref<2x10x30xf32, #tpu.memory_space<vmem>>, vector<1x8x30xf32>
    %119 = vector.shape_cast %118 : vector<1x8x30xf32> to vector<8x30xf32>
    %120 = vector.shape_cast %117 : vector<8x30xf32> to vector<1x8x30xf32>
    tpu.vector_store %arg11[%c1_123, %c1_124, %c0_125], %120 {strides = array<i32>} : memref<2x10x30xf32, #tpu.memory_space<vmem>>, vector<1x8x30xf32>,
    %c1_126 = arith.constant 1 : index
    %c0_127 = arith.constant 0 : index
    %c0_128 = arith.constant 0 : index
    %121 = vector.load %arg11[%c1_126, %c0_127, %c0_128] : memref<2x10x30xf32, #tpu.memory_space<vmem>>, vector<1x1x30xf32>
    %122 = vector.shape_cast %121 : vector<1x1x30xf32> to vector<1x30xf32>
    %123 = vector.shape_cast %1 : vector<1x30xf32> to vector<1x1x30xf32>
    tpu.vector_store %arg11[%c1_126, %c0_127, %c0_128], %123 {strides = array<i32>} : memref<2x10x30xf32, #tpu.memory_space<vmem>>, vector<1x1x30xf32>,
    %c1_129 = arith.constant 1 : index
    %c9_130 = arith.constant 9 : index
    %c0_131 = arith.constant 0 : index
    %124 = vector.load %arg11[%c1_129, %c9_130, %c0_131] : memref<2x10x30xf32, #tpu.memory_space<vmem>>, vector<1x1x30xf32>
    %125 = vector.shape_cast %124 : vector<1x1x30xf32> to vector<1x30xf32>
    %126 = vector.shape_cast %1 : vector<1x30xf32> to vector<1x1x30xf32>
    tpu.vector_store %arg11[%c1_129, %c9_130, %c0_131], %126 {strides = array<i32>} : memref<2x10x30xf32, #tpu.memory_space<vmem>>, vector<1x1x30xf32>,
    %cst_132 = arith.constant 0.000000e+00 : f32
    %127 = vector.broadcast %cst_132 : f32 to vector<8x80xf32>
    %c1_133 = arith.constant 1 : index
    %c0_134 = arith.constant 0 : index
    %c0_135 = arith.constant 0 : index
    %128 = vector.load %arg11[%c1_133, %c0_134, %c0_135] : memref<2x10x30xf32, #tpu.memory_space<vmem>>, vector<1x8x30xf32>
    %129 = vector.shape_cast %128 : vector<1x8x30xf32> to vector<8x30xf32>
    %c0_136 = arith.constant 0 : index
    %c0_137 = arith.constant 0 : index
    %c0_138 = arith.constant 0 : index
    %130 = vector.load %arg4[%c0_136, %c0_137, %c0_138] : memref<3x30x80xf32, #tpu.memory_space<vmem>>, vector<1x30x80xf32>
    %131 = vector.shape_cast %130 : vector<1x30x80xf32> to vector<30x80xf32>
    %cst_139 = arith.constant dense<0.000000e+00> : vector<8x80xf32>
    %132 = tpu.matmul %129, %131, %cst_139 {dimension_numbers = #tpu.dot_dimension_numbers<[1], [0], [0], [1], [0, 0, 1, 1], [], []>} : vector<8x30xf32>, vector<30x80xf32>, vector<8x80xf32> -> vector<8x80xf32>
    %133 = arith.addf %127, %132 : vector<8x80xf32>
    %c1_140 = arith.constant 1 : index
    %c1_141 = arith.constant 1 : index
    %c0_142 = arith.constant 0 : index
    %134 = vector.load %arg11[%c1_140, %c1_141, %c0_142] : memref<2x10x30xf32, #tpu.memory_space<vmem>>, vector<1x8x30xf32>
    %135 = vector.shape_cast %134 : vector<1x8x30xf32> to vector<8x30xf32>
    %c1_143 = arith.constant 1 : index
    %c0_144 = arith.constant 0 : index
    %c0_145 = arith.constant 0 : index
    %136 = vector.load %arg4[%c1_143, %c0_144, %c0_145] : memref<3x30x80xf32, #tpu.memory_space<vmem>>, vector<1x30x80xf32>
    %137 = vector.shape_cast %136 : vector<1x30x80xf32> to vector<30x80xf32>
    %cst_146 = arith.constant dense<0.000000e+00> : vector<8x80xf32>
    %138 = tpu.matmul %135, %137, %cst_146 {dimension_numbers = #tpu.dot_dimension_numbers<[1], [0], [0], [1], [0, 0, 1, 1], [], []>} : vector<8x30xf32>, vector<30x80xf32>, vector<8x80xf32> -> vector<8x80xf32>
    %139 = arith.addf %133, %138 : vector<8x80xf32>
    %c1_147 = arith.constant 1 : index
    %c2_148 = arith.constant 2 : index
    %c0_149 = arith.constant 0 : index
    %140 = vector.load %arg11[%c1_147, %c2_148, %c0_149] : memref<2x10x30xf32, #tpu.memory_space<vmem>>, vector<1x8x30xf32>
    %141 = vector.shape_cast %140 : vector<1x8x30xf32> to vector<8x30xf32>
    %c2_150 = arith.constant 2 : index
    %c0_151 = arith.constant 0 : index
    %c0_152 = arith.constant 0 : index
    %142 = vector.load %arg4[%c2_150, %c0_151, %c0_152] : memref<3x30x80xf32, #tpu.memory_space<vmem>>, vector<1x30x80xf32>
    %143 = vector.shape_cast %142 : vector<1x30x80xf32> to vector<30x80xf32>
    %cst_153 = arith.constant dense<0.000000e+00> : vector<8x80xf32>
    %144 = tpu.matmul %141, %143, %cst_153 {dimension_numbers = #tpu.dot_dimension_numbers<[1], [0], [0], [1], [0, 0, 1, 1], [], []>} : vector<8x30xf32>, vector<30x80xf32>, vector<8x80xf32> -> vector<8x80xf32>
    %145 = arith.addf %139, %144 : vector<8x80xf32>
    %c0_154 = arith.constant 0 : index
    %c0_155 = arith.constant 0 : index
    %146 = vector.load %arg5[%c0_154, %c0_155] : memref<1x80xf32, #tpu.memory_space<vmem>>, vector<1x80xf32>
    %147 = vector.broadcast %146 : vector<1x80xf32> to vector<8x80xf32>
    %148 = arith.addf %145, %147 : vector<8x80xf32>
    %cst_156 = arith.constant 0.000000e+00 : f32
    %149 = vector.broadcast %cst_156 : f32 to vector<8x80xf32>
    %150 = arith.maximumf %148, %149 : vector<8x80xf32>
    %c1_157 = arith.constant 1 : index
    %c1_158 = arith.constant 1 : index
    %c0_159 = arith.constant 0 : index
    %151 = vector.load %arg12[%c1_157, %c1_158, %c0_159] : memref<2x10x80xf32, #tpu.memory_space<vmem>>, vector<1x8x80xf32>
    %152 = vector.shape_cast %151 : vector<1x8x80xf32> to vector<8x80xf32>
    %153 = vector.shape_cast %150 : vector<8x80xf32> to vector<1x8x80xf32>
    tpu.vector_store %arg12[%c1_157, %c1_158, %c0_159], %153 {strides = array<i32>} : memref<2x10x80xf32, #tpu.memory_space<vmem>>, vector<1x8x80xf32>,
    %c1_160 = arith.constant 1 : index
    %c0_161 = arith.constant 0 : index
    %c0_162 = arith.constant 0 : index
    %154 = vector.load %arg12[%c1_160, %c0_161, %c0_162] : memref<2x10x80xf32, #tpu.memory_space<vmem>>, vector<1x1x80xf32>
    %155 = vector.shape_cast %154 : vector<1x1x80xf32> to vector<1x80xf32>
    %156 = vector.shape_cast %2 : vector<1x80xf32> to vector<1x1x80xf32>
    tpu.vector_store %arg12[%c1_160, %c0_161, %c0_162], %156 {strides = array<i32>} : memref<2x10x80xf32, #tpu.memory_space<vmem>>, vector<1x1x80xf32>,
    %c1_163 = arith.constant 1 : index
    %c9_164 = arith.constant 9 : index
    %c0_165 = arith.constant 0 : index
    %157 = vector.load %arg12[%c1_163, %c9_164, %c0_165] : memref<2x10x80xf32, #tpu.memory_space<vmem>>, vector<1x1x80xf32>
    %158 = vector.shape_cast %157 : vector<1x1x80xf32> to vector<1x80xf32>
    %159 = vector.shape_cast %2 : vector<1x80xf32> to vector<1x1x80xf32>
    tpu.vector_store %arg12[%c1_163, %c9_164, %c0_165], %159 {strides = array<i32>} : memref<2x10x80xf32, #tpu.memory_space<vmem>>, vector<1x1x80xf32>,
    %cst_166 = arith.constant 0.000000e+00 : f32
    %160 = vector.broadcast %cst_166 : f32 to vector<8x128xf32>
    %c1_167 = arith.constant 1 : index
    %c0_168 = arith.constant 0 : index
    %c0_169 = arith.constant 0 : index
    %161 = vector.load %arg12[%c1_167, %c0_168, %c0_169] : memref<2x10x80xf32, #tpu.memory_space<vmem>>, vector<1x8x80xf32>
    %162 = vector.shape_cast %161 : vector<1x8x80xf32> to vector<8x80xf32>
    %c0_170 = arith.constant 0 : index
    %c0_171 = arith.constant 0 : index
    %c0_172 = arith.constant 0 : index
    %163 = vector.load %arg6[%c0_170, %c0_171, %c0_172] : memref<3x80x128xf32, #tpu.memory_space<vmem>>, vector<1x80x128xf32>
    %164 = vector.shape_cast %163 : vector<1x80x128xf32> to vector<80x128xf32>
    %cst_173 = arith.constant dense<0.000000e+00> : vector<8x128xf32>
    %165 = tpu.matmul %162, %164, %cst_173 {dimension_numbers = #tpu.dot_dimension_numbers<[1], [0], [0], [1], [0, 0, 1, 1], [], []>} : vector<8x80xf32>, vector<80x128xf32>, vector<8x128xf32> -> vector<8x128xf32>
    %166 = arith.addf %160, %165 : vector<8x128xf32>
    %c1_174 = arith.constant 1 : index
    %c1_175 = arith.constant 1 : index
    %c0_176 = arith.constant 0 : index
    %167 = vector.load %arg12[%c1_174, %c1_175, %c0_176] : memref<2x10x80xf32, #tpu.memory_space<vmem>>, vector<1x8x80xf32>
    %168 = vector.shape_cast %167 : vector<1x8x80xf32> to vector<8x80xf32>
    %c1_177 = arith.constant 1 : index
    %c0_178 = arith.constant 0 : index
    %c0_179 = arith.constant 0 : index
    %169 = vector.load %arg6[%c1_177, %c0_178, %c0_179] : memref<3x80x128xf32, #tpu.memory_space<vmem>>, vector<1x80x128xf32>
    %170 = vector.shape_cast %169 : vector<1x80x128xf32> to vector<80x128xf32>
    %cst_180 = arith.constant dense<0.000000e+00> : vector<8x128xf32>
    %171 = tpu.matmul %168, %170, %cst_180 {dimension_numbers = #tpu.dot_dimension_numbers<[1], [0], [0], [1], [0, 0, 1, 1], [], []>} : vector<8x80xf32>, vector<80x128xf32>, vector<8x128xf32> -> vector<8x128xf32>
    %172 = arith.addf %166, %171 : vector<8x128xf32>
    %c1_181 = arith.constant 1 : index
    %c2_182 = arith.constant 2 : index
    %c0_183 = arith.constant 0 : index
    %173 = vector.load %arg12[%c1_181, %c2_182, %c0_183] : memref<2x10x80xf32, #tpu.memory_space<vmem>>, vector<1x8x80xf32>
    %174 = vector.shape_cast %173 : vector<1x8x80xf32> to vector<8x80xf32>
    %c2_184 = arith.constant 2 : index
    %c0_185 = arith.constant 0 : index
    %c0_186 = arith.constant 0 : index
    %175 = vector.load %arg6[%c2_184, %c0_185, %c0_186] : memref<3x80x128xf32, #tpu.memory_space<vmem>>, vector<1x80x128xf32>
    %176 = vector.shape_cast %175 : vector<1x80x128xf32> to vector<80x128xf32>
    %cst_187 = arith.constant dense<0.000000e+00> : vector<8x128xf32>
    %177 = tpu.matmul %174, %176, %cst_187 {dimension_numbers = #tpu.dot_dimension_numbers<[1], [0], [0], [1], [0, 0, 1, 1], [], []>} : vector<8x80xf32>, vector<80x128xf32>, vector<8x128xf32> -> vector<8x128xf32>
    %178 = arith.addf %172, %177 : vector<8x128xf32>
    %c0_188 = arith.constant 0 : index
    %c0_189 = arith.constant 0 : index
    %179 = vector.load %arg7[%c0_188, %c0_189] : memref<1x128xf32, #tpu.memory_space<vmem>>, vector<1x128xf32>
    %180 = vector.broadcast %179 : vector<1x128xf32> to vector<8x128xf32>
    %181 = arith.addf %178, %180 : vector<8x128xf32>
    %c0_190 = arith.constant 0 : index
    %c0_191 = arith.constant 0 : index
    %182 = vector.load %arg8[%c0_190, %c0_191] : memref<128x64xf32, #tpu.memory_space<vmem>>, vector<128x64xf32>
    %cst_192 = arith.constant dense<0.000000e+00> : vector<8x64xf32>
    %183 = tpu.matmul %181, %182, %cst_192 {dimension_numbers = #tpu.dot_dimension_numbers<[1], [0], [0], [1], [0, 0, 1, 1], [], []>} : vector<8x128xf32>, vector<128x64xf32>, vector<8x64xf32> -> vector<8x64xf32>
    %c0_193 = arith.constant 0 : index
    %c0_194 = arith.constant 0 : index
    %184 = vector.load %arg9[%c0_193, %c0_194] : memref<4x8xf32, #tpu.memory_space<vmem>>, vector<4x8xf32>
    %cst_195 = arith.constant dense<0.000000e+00> : vector<4x64xf32>
    %185 = tpu.matmul %184, %183, %cst_195 {dimension_numbers = #tpu.dot_dimension_numbers<[1], [0], [0], [1], [0, 0, 1, 1], [], []>} : vector<4x8xf32>, vector<8x64xf32>, vector<4x64xf32> -> vector<4x64xf32>
    %c1_196 = arith.constant 1 : index
    %c0_197 = arith.constant 0 : index
    %c0_198 = arith.constant 0 : index
    %186 = vector.load %arg10[%c1_196, %c0_197, %c0_198] : memref<2x4x64xf32, #tpu.memory_space<vmem>>, vector<1x4x64xf32>
    %187 = vector.shape_cast %186 : vector<1x4x64xf32> to vector<4x64xf32>
    %188 = vector.shape_cast %185 : vector<4x64xf32> to vector<1x4x64xf32>
    tpu.vector_store %arg10[%c1_196, %c0_197, %c0_198], %188 {strides = array<i32>} : memref<2x4x64xf32, #tpu.memory_space<vmem>>, vector<1x4x64xf32>,
    return
  }
  func.func @transform_0(%arg0: i32) -> (i32, i32, i32) {
    %c0_i32 = arith.constant 0 : i32
    %c0_i32_0 = arith.constant 0 : i32
    %c0_i32_1 = arith.constant 0 : i32
    return %arg0, %c0_i32, %c0_i32_0 : i32, i32, i32
  }
  func.func @transform_1(%arg0: i32) -> (i32, i32) {
    %c0_i32 = arith.constant 0 : i32
    %c0_i32_0 = arith.constant 0 : i32
    %c0_i32_1 = arith.constant 0 : i32
    return %c0_i32, %c0_i32_0 : i32, i32
  }
  func.func @transform_2(%arg0: i32) -> (i32, i32, i32) {
    %c0_i32 = arith.constant 0 : i32
    %c0_i32_0 = arith.constant 0 : i32
    %c0_i32_1 = arith.constant 0 : i32
    %c0_i32_2 = arith.constant 0 : i32
    return %c0_i32, %c0_i32_0, %c0_i32_1 : i32, i32, i32
  }
  func.func @transform_3(%arg0: i32) -> (i32, i32, i32) {
    %c0_i32 = arith.constant 0 : i32
    %c0_i32_0 = arith.constant 0 : i32
    %c0_i32_1 = arith.constant 0 : i32
    %c0_i32_2 = arith.constant 0 : i32
    return %c0_i32, %c0_i32_0, %c0_i32_1 : i32, i32, i32
  }
  func.func @transform_4(%arg0: i32) -> (i32, i32) {
    %c0_i32 = arith.constant 0 : i32
    %c0_i32_0 = arith.constant 0 : i32
    %c0_i32_1 = arith.constant 0 : i32
    return %c0_i32, %c0_i32_0 : i32, i32
  }
  func.func @transform_5(%arg0: i32) -> (i32, i32, i32) {
    %c0_i32 = arith.constant 0 : i32
    %c0_i32_0 = arith.constant 0 : i32
    %c0_i32_1 = arith.constant 0 : i32
    %c0_i32_2 = arith.constant 0 : i32
    return %c0_i32, %c0_i32_0, %c0_i32_1 : i32, i32, i32
  }
  func.func @transform_6(%arg0: i32) -> (i32, i32) {
    %c0_i32 = arith.constant 0 : i32
    %c0_i32_0 = arith.constant 0 : i32
    %c0_i32_1 = arith.constant 0 : i32
    return %c0_i32, %c0_i32_0 : i32, i32
  }
  func.func @transform_7(%arg0: i32) -> (i32, i32) {
    %c0_i32 = arith.constant 0 : i32
    %c0_i32_0 = arith.constant 0 : i32
    %c0_i32_1 = arith.constant 0 : i32
    return %c0_i32, %c0_i32_0 : i32, i32
  }
  func.func @transform_8(%arg0: i32) -> (i32, i32) {
    %c0_i32 = arith.constant 0 : i32
    %c0_i32_0 = arith.constant 0 : i32
    %c0_i32_1 = arith.constant 0 : i32
    return %c0_i32, %c0_i32_0 : i32, i32
  }
  func.func @transform_9(%arg0: i32) -> (i32, i32, i32) {
    %c0_i32 = arith.constant 0 : i32
    %c0_i32_0 = arith.constant 0 : i32
    %c0_i32_1 = arith.constant 0 : i32
    return %arg0, %c0_i32, %c0_i32_0 : i32, i32, i32
  }
}

</mosaic_0001>

<bundles_post_ra>
// kernel: tpu_custom_call.1
= control target key start
LH: loop header
LB: loop body
LE: loop exit
PB: predicated region body
PF: predicated region fallthrough
CT: control target
= control target key end

     0   :  { %14 = vsyncpa [#allocation5], 0  ;;  %s5884_s0 = inlined_call_operand.hbm [shape: f32[4,384,128], index: 0, kind: input, shape index: {}]   ;;  %s5885_s1 = inlined_call_operand.vmem [shape: f32[8,128], index: 1, kind: input, shape index: {}]   ;;  %s5886_s2 = inlined_call_operand.vmem [shape: f32[3,128,30], index: 2, kind: input, shape index: {}]   ;;  %s5887_s3 = inlined_call_operand.vmem [shape: f32[3,30,80], index: 3, kind: input, shape index: {}]   ;;  %s5888_s4 = inlined_call_operand.vmem [shape: f32[1,80], index: 4, kind: input, shape index: {}]   ;;  %s5889_s5 = inlined_call_operand.vmem [shape: f32[3,80,128], index: 5, kind: input, shape index: {}]   ;;  %s5890_s6 = inlined_call_operand.vmem [shape: f32[1,128], index: 6, kind: input, shape index: {}]   ;;  %s5891_s7 = inlined_call_operand.vmem [shape: f32[128,64], index: 7, kind: input, shape index: {}]   ;;  %s5892_s8 = inlined_call_operand.vmem [shape: f32[4,8], index: 8, kind: input, shape index: {}]   ;;  %s5893_s9 = inlined_call_operand.hbm [shape: f32[4,4,64], index: 9, kind: output, shape index: {}]  }
   0x1   :  { %16 = vsyncpa [#allocation5 + $0x1], 0 }
   0x2   :  { %17 = vsyncpa [#allocation6], 0 }
   0x3   :  { %19 = vsyncpa [#allocation6 + $0x1], 0  ;;  %s4796_s30 = smov 0   ;;  %s4798_s10 = smov 0  }
   0x4   :  { %s4800_s11 = smov 0   ;;  %s4802_s12 = smov 0  }
   0x5 LB: > { %5907 = sst [smem:[#allocation10_spill]] %s4730_s11  ;;  %s4817_s13 = sadd.s32 4294967295, %s4734_s12   ;;  %s4734_s12 = sphi %s4802_s12, %s5938_s12   ;;  %s4730_s11 = sphi %s4800_s11, %s5935_s11   ;;  %s4726_s10 = sphi %s4798_s10, %s5937_s10   ;;  %s4722_s30 = sphi %s4796_s30, %s5936_s30  }
   0x6   : > { %s2855_s14 = sadd.s32 4294967294, %s4734_s12   ;;  %s4821_s15 = sadd.s32 1, %s4734_s12  }
   0x7   : > { %s32_s16 = sadd.s32 1, %s4730_s11  ;;  %s29_s17 = ssub.s32 %s4734_s12, %s4821_s15 }
   0x8   : > { %p39_p0 = scmp.ne.s32.totalorder %s4730_s11, %s4726_s10  ;;  %p30_p1 = scmp.eq.s32.totalorder %s29_s17, 0 }
   0x9   : > { %p40_p2 = scmp.eq.s32.totalorder %s4734_s12, 0  ;;  %p45_p3 = scmp.ne.s32.totalorder %s4726_s10, %s4722_s30 }
   0xa   : > { %p46_p4 = scmp.eq.s32.totalorder %s4817_s13, 0  ;;  %p237_p7 = scmp.eq.s32.totalorder %s4817_s13, 1 }
   0xb   : > { %s4833_s18 = scalar_select %p30_p1, %s4730_s11, %s32_s16  }
   0xc   : > { %p41_p5 = por %p40_p2, %p39_p0  ;;  %p4835_p6 = por %p46_p4, %p45_p3 }
   0xd   : > { %5908 = sst [smem:[#allocation11_spill]] %s4833_s18  ;;  %p243_p8 = scmp.eq.s32.totalorder %s2855_s14, 1 }
   0xe   : > { %p4595_p10 = scmp.lt.s32.totalorder %s4734_s12, 2  ;;  %p4842_p11 = por %p237_p7, %p39_p0 }
   0xf   : > { %p4846_p12 = por %p243_p8, %p45_p3  ;;  %s287_s22 = sand.u32 1, %s4730_s11  }
  0x10   : > { %s5910_s20 = scalar_select %p4842_p11, 1, 0 }
  0x11   : > { %s5911_s21 = scalar_select %p4846_p12, 1, 0 }
  0x12   : > { %s4581_s23 = smul.u32 12288, %s4734_s12  ;;  %p4857_p13 = pnand %p4595_p10, %p41_p5 }
  0x13   : > { %s4580_s24 = smul.u32 768, %s287_s22  ;;  %s4863_s16 = scalar_lea.sflag [#allocation5], %s287_s22 }
  0x14   : > { %s4855_s27 = scalar_lea.hbm %s5884_s0, %s4581_s23  ;;  %p4640_p1 = pneg %p4857_p13 }
  0x15   : > { %s291_s29 = scalar_lea.vmem [#allocation4], %s4580_s24  ;;  %s4638_s17 = scalar_lea.hbm %s4855_s27, 12288 }
  0x16   : > { %s299_s14 = sshll.u32 %s291_s29, 4  ;;  %p4639_p0 = scmp.ne.s32.totalorder %s4855_s27, %s4638_s17  ;;  %s4861_s14 = int_to_ptr.vmem [resolvable:$true] %s299_s14 }
  0x17   : > { %s4643_s26 = scalar_lea.hbm %s5884_s0, 24576  ;;  %p4644_p4 = scmp.lt.u32.totalorder %s4855_s27, %s5884_s0 }
  0x18   : > { %p4641_p2 = pnand %p4640_p1, %p4639_p0  ;;  %p4645_p5 = scmp.lt.u32.totalorder %s4643_s26, %s4638_s17 }
  0x19   : > { %p4647_p8 = scmp.lt.u32.totalorder %s4638_s17, %s4855_s27 }
  0x1a   : > { %p4642_p3 = pneg %p4641_p2  ;;  %p4646_p7 = por %p4645_p5, %p4644_p4 }
  0x1c   : > { %p4648_p10 = por %p4647_p8, %p4646_p7 }
  0x1e   : > { %p4649_p9 = pnand %p4648_p10, %p4642_p3 }
  0x20   : > { %4652 = shalt.err (!%p4649_p9)
}
  0x21   : > { %s4653_s22 = scalar_lea.vmem %s4861_s14, 12288  ;;  %s4736_s24 = smov [#allocation4]  }
  0x22   : > { %p4654_p0 = scmp.ne.s32.totalorder %s4861_s14, %s4653_s22  ;;  %s4658_s29 = sshll.u32 %s4736_s24, 4  ;;  %s4659_s29 = int_to_ptr.vmem [resolvable:$false] %s4658_s29 }
  0x23   : > { %s4660_s11 = scalar_lea.vmem %s4659_s29, 24576  ;;  %p4661_p11 = scmp.lt.s32.totalorder %s4861_s14, %s4659_s29 }
  0x24   : > { %p4656_p2 = pnand %p4654_p0, %p4640_p1  ;;  %p4662_p4 = scmp.lt.s32.totalorder %s4660_s11, %s4653_s22 }
  0x26   : > { %p4657_p12 = pneg %p4656_p2  ;;  %p4663_p5 = por %p4662_p4, %p4661_p11 }
  0x28   : > { %p4664_p7 = pnand %p4663_p5, %p4657_p12 }
  0x2a   : > { %4667 = shalt.err (!%p4664_p7)
}
  0x2b   : > { %s4737_s18 = smov 128   ;;  %s4738_s17 = smov 8  }
  0x2c   : > { %4590 = dma.hbm_to_vmem [thread:$0]  (!%p4857_p13), %s4855_s27, 12288, %s4861_s14, %s4863_s16, %s4737_s18, %s4737_s18, %s4738_s17  }
  0x2d   : > { %p2861_p9 = scmp.ge.s32.totalorder %s4734_s12, 1  ;;  %p307_p1 = scmp.lt.s32.totalorder %s4734_s12, 3 }
  0x2f   : > { %p308_p3 = pnand %p2861_p9, %p307_p1 }
  0x31   : > { %311 = sbr.rel (%p308_p3) target bundleno = 2693 (0xa85), region = 56 }
  0x38   : > { %s4894_s23 = sand.u32 1, %s4726_s10  }
  0x39   : > { %s4582_s25 = smul.u32 768, %s4894_s23  ;;  %s314_s26 = scalar_lea.sflag [#allocation5], %s4894_s23 }
  0x3b   : > { %s4898_s22 = scalar_lea.vmem [#allocation4], %s4582_s25 }
  0x3c   : > { %4713 = dma.done.wait (%p4835_p6), %s314_s26, 12288  }
  0x3d   : > { %4715 = vsyncadd (%p4835_p6), %s314_s26, 4294955008  ;;  %v5902_v0 = vmov 0.0|0.0   ;;  %vm4740_vm0 = vmmov 0   ;;  %v5896_v1 = vmov 0.0   ;;  %v457_v2 = vld [vmem:[%s4898_s22 + $0x80] sm:$0xff]  ;;  %v458_v3 = vld [vmem:[%s4898_s22 + $0x88] sm:$0xff] }
  0x3e   : > { %4128 = vmatprep.subr.bf16.mxu1 %v5902_v0  ;;  %4104 = vmatprep.subr.bf16.mxu0 %v5902_v0  ;;  %v459_v4 = vld [vmem:[%s4898_s22 + $0x90] sm:$0xff]  ;;  %v4129_v5 = vpack.c.bf16 %v458_v3, %v457_v2  ;;  %v460_v6 = vld [vmem:[%s4898_s22 + $0x98] sm:$0xff]  ;;  %v461_v8 = vld [vmem:[%s4898_s22 + $0xa0] sm:$0xff]  ;;  %vm876_vm1 = vcmask 237568   ;;  %vm893_vm2 = vcmask 1045504   ;;  %vm4742_vm3 = vmmov 1  }
  0x3f   : > { %3467 = vmatprep.mubr.msk.f32.mxu1 %vm4740_vm0, %v5896_v1  ;;  %3432 = vmatprep.mubr.msk.f32.mxu0 %vm4740_vm0, %v5896_v1  ;;  %v4132_v7 = vpack.c.bf16 %v460_v6, %v459_v4  ;;  %v462_v9 = vld [vmem:[%s4898_s22 + $0xa8] sm:$0xff]  ;;  %v355_v10 = vld [vmem:[%s4898_s22] sm:$0xff]  ;;  %v357_v13 = vld [vmem:[%s4898_s22 + $0x10] sm:$0xff]  ;;  %877 = vst.msk [vmem:[#allocation2] sm:$0x1] %vm876_vm1, %v5896_v1  ;;  %vm874_vm5 = vcmask 244736  }
  0x40   : > { %4130 = vmatpush3.bf16.msra.mxu1 %v4129_v5  ;;  %v356_v11 = vld [vmem:[%s4898_s22 + $0x8] sm:$0xff]  ;;  %v358_v14 = vld [vmem:[%s4898_s22 + $0x18] sm:$0xff]  ;;  %v4135_v15 = vpack.c.bf16 %v462_v9, %v461_v8  ;;  %v463_v16 = vld [vmem:[%s4898_s22 + $0xb0] sm:$0xff]  ;;  %878 = vst.msk [vmem:[#allocation2 + $0x9] sm:$0x1] %vm876_vm1, %v5896_v1  ;;  %vm1137_vm6 = vcmask 647168  }
  0x41   : > { %4131 = vmatprep.subr.bf16.mxu1 %v5902_v0  ;;  %v4105_v12 = vpack.c.bf16 %v356_v11, %v355_v10  ;;  %v464_v17 = vld [vmem:[%s4898_s22 + $0xb8] sm:$0xff]  ;;  %v4108_v18 = vpack.c.bf16 %v358_v14, %v357_v13  ;;  %v359_v19 = vld [vmem:[%s4898_s22 + $0x20] sm:$0xff]  ;;  %v360_v20 = vld [vmem:[%s4898_s22 + $0x28] sm:$0xff]  ;;  %2086 = vst.msk [vmem:[#allocation2 + $0x10] sm:$0x1] %vm876_vm1, %v5896_v1  ;;  %vm1135_vm7 = vcmask 654336  }
  0x42   : > { %v4138_v21 = vpack.c.bf16 %v464_v17, %v463_v16  ;;  %v465_v22 = vld [vmem:[%s4898_s22 + $0xc0] sm:$0xff]  ;;  %v466_v23 = vld [vmem:[%s4898_s22 + $0xc8] sm:$0xff]  ;;  %v4111_v24 = vpack.c.bf16 %v360_v20, %v359_v19  ;;  %v361_v25 = vld [vmem:[%s4898_s22 + $0x30] sm:$0xff]  ;;  %2087 = vst.msk [vmem:[#allocation2 + $0x19] sm:$0x1] %vm876_vm1, %v5896_v1  ;;  %vm1490_vm8 = vcmask 64512  }
  0x43   : > { %4106 = vmatpush3.bf16.msra.mxu0 %v4105_v12  ;;  %v362_v26 = vld [vmem:[%s4898_s22 + $0x38] sm:$0xff]  ;;  %v4141_v27 = vpack.c.bf16 %v466_v23, %v465_v22  ;;  %v467_v28 = vld [vmem:[%s4898_s22 + $0xd0] sm:$0xff]  ;;  %v363_v31 = vld [vmem:[%s4898_s22 + $0x40] sm:$0xff]  ;;  %1139 = vst.msk [vmem:[#allocation3 + $0x9] sm:$0x1] %vm1137_vm6, %v5896_v1  ;;  %vm1564_vm9 = vcmask 519168  }
  0x44   : > { %4133 = vmatpush3.bf16.msra.mxu1 %v4132_v7  ;;  %4107 = vmatprep.subr.bf16.mxu0 %v5902_v0  ;;  %v468_v29 = vld [vmem:[%s4898_s22 + $0xd8] sm:$0xff]  ;;  %v4114_v30 = vpack.c.bf16 %v362_v26, %v361_v25  ;;  %v364_v32 = vld [vmem:[%s4898_s22 + $0x48] sm:$0xff]  ;;  %v469_v34 = vld [vmem:[%s4898_s22 + $0xe0] sm:$0xff]  ;;  %1138 = vst.msk [vmem:[#allocation3] sm:$0x1] %vm1137_vm6, %v5896_v1  ;;  %s3061_s16 = sshll.u32 %s4817_s13, 7 }
  0x45   : > { %4134 = vmatprep.subr.bf16.mxu1 %v5902_v0  ;;  %v4144_v33 = vpack.c.bf16 %v468_v29, %v467_v28  ;;  %v470_v35 = vld [vmem:[%s4898_s22 + $0xe8] sm:$0xff]  ;;  %v4117_v36 = vpack.c.bf16 %v364_v32, %v363_v31  ;;  %v365_v37 = vld [vmem:[%s4898_s22 + $0x50] sm:$0xff]  ;;  %v366_v38 = vld [vmem:[%s4898_s22 + $0x58] sm:$0xff]  ;;  %2343 = vst.msk [vmem:[#allocation3 + $0x10] sm:$0x1] %vm1137_vm6, %v5896_v1  ;;  %s5838_s11 = scalar_lea.hbm %s5893_s9, %s3061_s16  ;;  %s2769_s18 = scalar_lea.sflag [#allocation6], %s4894_s23 }
  0x46   : > { %v4147_v39 = vpack.c.bf16 %v470_v35, %v469_v34  ;;  %v471_v40 = vld [vmem:[%s4898_s22 + $0xf0] sm:$0xff]  ;;  %v472_v41 = vld [vmem:[%s4898_s22 + $0xf8] sm:$0xff]  ;;  %v4120_v42 = vpack.c.bf16 %v366_v38, %v365_v37  ;;  %v367_v43 = vld [vmem:[%s4898_s22 + $0x60] sm:$0xff]  ;;  %2344 = vst.msk [vmem:[#allocation3 + $0x19] sm:$0x1] %vm1137_vm6, %v5896_v1  ;;  %p5931_p11 = scmp.ne.s32.totalorder %s5910_s20, 0 }
  0x47   : > { %4109 = vmatpush3.bf16.msra.mxu0 %v4108_v18  ;;  %v368_v44 = vld [vmem:[%s4898_s22 + $0x68] sm:$0xff]  ;;  %v4150_v45 = vpack.c.bf16 %v472_v41, %v471_v40  ;;  %v700_v47 = vld [vmem:[%s4898_s22 + $0x100] sm:$0xff]  ;;  %v369_v49 = vld [vmem:[%s4898_s22 + $0x70] sm:$0xff]  ;;  %s4743_s13 = smov [#allocation7]  }
  0x48   : > { %4136 = vmatpush3.bf16.msra.mxu1 %v4135_v15  ;;  %4110 = vmatprep.subr.bf16.mxu0 %v5902_v0  ;;  %v4123_v46 = vpack.c.bf16 %v368_v44, %v367_v43  ;;  %v701_v48 = vld [vmem:[%s4898_s22 + $0x108] sm:$0xff]  ;;  %v370_v50 = vld [vmem:[%s4898_s22 + $0x78] sm:$0xff]  ;;  %v4960_v51 = vld [vmem:[%s5885_s1] sm:$0xff]  ;;  %s4672_s25 = sshll.u32 %s4743_s13, 4  ;;  %s4673_s25 = int_to_ptr.vmem [resolvable:$false] %s4672_s25 }
  0x49   : > { %4137 = vmatprep.subr.bf16.mxu1 %v5902_v0  ;;  %v4201_v52 = vpack.c.bf16 %v701_v48, %v700_v47  ;;  %v4126_v53 = vpack.c.bf16 %v370_v50, %v369_v49  ;;  %v702_v54 = vld [vmem:[%s4898_s22 + $0x110] sm:$0xff]  ;;  %v703_v55 = vld [vmem:[%s4898_s22 + $0x118] sm:$0xff]  ;;  %v2863_v56 = vld [vmem:[%s5886_s2 + $0x80] sm:$0xff]  ;;  %s4674_s26 = scalar_lea.vmem %s4673_s25, 256 }
  0x4a   : > { %v2864_v57 = vld [vmem:[%s5886_s2 + $0x88] sm:$0xff]  ;;  %v4204_v58 = vpack.c.bf16 %v703_v55, %v702_v54  ;;  %v704_v59 = vld [vmem:[%s4898_s22 + $0x120] sm:$0xff]  ;;  %v2865_v62 = vld [vmem:[%s5886_s2 + $0x90] sm:$0xff] }
  0x4b   : > { %4112 = vmatpush3.bf16.msra.mxu0 %v4111_v24  ;;  %v705_v60 = vld [vmem:[%s4898_s22 + $0x128] sm:$0xff]  ;;  %v4978_v61 = vpack.c.bf16 %v2864_v57, %v2863_v56  ;;  %v2866_v63 = vld [vmem:[%s5886_s2 + $0x98] sm:$0xff]  ;;  %v706_v3 = vld [vmem:[%s4898_s22 + $0x130] sm:$0xff] }
  0x4c   : > { %4139 = vmatpush3.bf16.msra.mxu1 %v4138_v21  ;;  %4113 = vmatprep.subr.bf16.mxu0 %v5902_v0  ;;  %v4207_v2 = vpack.c.bf16 %v705_v60, %v704_v59  ;;  %v707_v4 = vld [vmem:[%s4898_s22 + $0x138] sm:$0xff]  ;;  %v4992_v5 = vpack.c.bf16 %v2866_v63, %v2865_v62  ;;  %v2867_v6 = vld [vmem:[%s5886_s2 + $0xa0] sm:$0xff]  ;;  %v2868_v7 = vld [vmem:[%s5886_s2 + $0xa8] sm:$0xff] }
  0x4d   : > { %4140 = vmatprep.subr.bf16.mxu1 %v5902_v0  ;;  %v4210_v8 = vpack.c.bf16 %v707_v4, %v706_v3  ;;  %v708_v9 = vld [vmem:[%s4898_s22 + $0x140] sm:$0xff]  ;;  %v709_v10 = vld [vmem:[%s4898_s22 + $0x148] sm:$0xff]  ;;  %v5007_v11 = vpack.c.bf16 %v2868_v7, %v2867_v6  ;;  %v2869_v12 = vld [vmem:[%s5886_s2 + $0xb0] sm:$0xff] }
  0x4e   : > { %v2870_v13 = vld [vmem:[%s5886_s2 + $0xb8] sm:$0xff]  ;;  %v4213_v14 = vpack.c.bf16 %v709_v10, %v708_v9  ;;  %v710_v15 = vld [vmem:[%s4898_s22 + $0x150] sm:$0xff]  ;;  %v2871_v18 = vld [vmem:[%s5886_s2 + $0xc0] sm:$0xff] }
  0x4f   : > { %4115 = vmatpush3.bf16.msra.mxu0 %v4114_v30  ;;  %v711_v16 = vld [vmem:[%s4898_s22 + $0x158] sm:$0xff]  ;;  %v5020_v17 = vpack.c.bf16 %v2870_v13, %v2869_v12  ;;  %v2872_v19 = vld [vmem:[%s5886_s2 + $0xc8] sm:$0xff]  ;;  %v712_v21 = vld [vmem:[%s4898_s22 + $0x160] sm:$0xff] }
  0x50   : > { %4142 = vmatpush3.bf16.msra.mxu1 %v4141_v27  ;;  %4116 = vmatprep.subr.bf16.mxu0 %v5902_v0  ;;  %v4216_v20 = vpack.c.bf16 %v711_v16, %v710_v15  ;;  %v713_v22 = vld [vmem:[%s4898_s22 + $0x168] sm:$0xff]  ;;  %v5033_v23 = vpack.c.bf16 %v2872_v19, %v2871_v18  ;;  %v2873_v24 = vld [vmem:[%s5886_s2 + $0xd0] sm:$0xff]  ;;  %v2874_v25 = vld [vmem:[%s5886_s2 + $0xd8] sm:$0xff] }
  0x51   : > { %4143 = vmatprep.subr.bf16.mxu1 %v5902_v0  ;;  %v4219_v26 = vpack.c.bf16 %v713_v22, %v712_v21  ;;  %v714_v27 = vld [vmem:[%s4898_s22 + $0x170] sm:$0xff]  ;;  %v715_v28 = vld [vmem:[%s4898_s22 + $0x178] sm:$0xff]  ;;  %v5046_v29 = vpack.c.bf16 %v2874_v25, %v2873_v24  ;;  %v2875_v30 = vld [vmem:[%s5886_s2 + $0xe0] sm:$0xff] }
  0x52   : > { %v2876_v31 = vld [vmem:[%s5886_s2 + $0xe8] sm:$0xff]  ;;  %v4222_v32 = vpack.c.bf16 %v715_v28, %v714_v27  ;;  %v2877_v34 = vld [vmem:[%s5886_s2 + $0xf0] sm:$0xff]  ;;  %v2878_v35 = vld [vmem:[%s5886_s2 + $0xf8] sm:$0xff] }
  0x53   : > { %4118 = vmatpush3.bf16.msra.mxu0 %v4117_v36  ;;  %v5067_v36 = vpack.c.bf16 %v2878_v35, %v2877_v34  ;;  %v441_v37 = vld [vmem:[%s5886_s2] sm:$0xff]  ;;  %v442_v38 = vld [vmem:[%s5886_s2 + $0x8] sm:$0xff]  ;;  %v443_v40 = vld [vmem:[%s5886_s2 + $0x10] sm:$0xff] }
  0x54   : > { %4145 = vmatpush3.bf16.msra.mxu1 %v4144_v33  ;;  %4119 = vmatprep.subr.bf16.mxu0 %v5902_v0  ;;  %v5057_v33 = vpack.c.bf16 %v2876_v31, %v2875_v30  ;;  %v444_v41 = vld [vmem:[%s5886_s2 + $0x18] sm:$0xff]  ;;  %v447_v50 = vld [vmem:[%s5886_s2 + $0x30] sm:$0xff]  ;;  %v449_v54 = vld [vmem:[%s5886_s2 + $0x40] sm:$0xff] }
  0x55   : > { %4146 = vmatprep.subr.bf16.mxu1 %v5902_v0  ;;  %v5091_v44 = vpack.c.bf16 %v444_v41, %v443_v40  ;;  %v450_v55 = vld [vmem:[%s5886_s2 + $0x48] sm:$0xff]  ;;  %v451_v57 = vld [vmem:[%s5886_s2 + $0x50] sm:$0xff]  ;;  %v453_v60 = vld [vmem:[%s5886_s2 + $0x60] sm:$0xff] }
  0x56   : > { %v5123_v56 = vpack.c.bf16 %v450_v55, %v449_v54  ;;  %v454_v62 = vld [vmem:[%s5886_s2 + $0x68] sm:$0xff]  ;;  %v456_v3 = vld [vmem:[%s5886_s2 + $0x78] sm:$0xff]  ;;  %v2879_v6 = vld [vmem:[%s5886_s2 + $0x100] sm:$0xff] }
  0x57   : > { %4121 = vmatpush3.bf16.msra.mxu0 %v4120_v42  ;;  %v5143_v63 = vpack.c.bf16 %v454_v62, %v453_v60  ;;  %v2880_v7 = vld [vmem:[%s5886_s2 + $0x108] sm:$0xff]  ;;  %v2881_v9 = vld [vmem:[%s5886_s2 + $0x110] sm:$0xff]  ;;  %v2882_v10 = vld [vmem:[%s5886_s2 + $0x118] sm:$0xff] }
  0x58   : > { %4148 = vmatpush3.bf16.msra.mxu1 %v4147_v39  ;;  %4122 = vmatprep.subr.bf16.mxu0 %v5902_v0  ;;  %v5082_v39 = vpack.c.bf16 %v442_v38, %v441_v37  ;;  %v2883_v15 = vld [vmem:[%s5886_s2 + $0x120] sm:$0xff]  ;;  %v2884_v16 = vld [vmem:[%s5886_s2 + $0x128] sm:$0xff]  ;;  %v2885_v19 = vld [vmem:[%s5886_s2 + $0x130] sm:$0xff] }
  0x59   : > { %4149 = vmatprep.subr.bf16.mxu1 %v5902_v0  ;;  %v5185_v18 = vpack.c.bf16 %v2884_v16, %v2883_v15  ;;  %v2887_v22 = vld [vmem:[%s5886_s2 + $0x140] sm:$0xff]  ;;  %v2888_v24 = vld [vmem:[%s5886_s2 + $0x148] sm:$0xff]  ;;  %v2890_v27 = vld [vmem:[%s5886_s2 + $0x158] sm:$0xff] }
  0x5a   : > { %v5205_v25 = vpack.c.bf16 %v2888_v24, %v2887_v22  ;;  %v2891_v30 = vld [vmem:[%s5886_s2 + $0x160] sm:$0xff]  ;;  %v2892_v31 = vld [vmem:[%s5886_s2 + $0x168] sm:$0xff]  ;;  %v2893_v34 = vld [vmem:[%s5886_s2 + $0x170] sm:$0xff] }
  0x5b   : > { %4124 = vmatpush3.bf16.msra.mxu0 %v4123_v46  ;;  %v446_v46 = vld [vmem:[%s5886_s2 + $0x28] sm:$0xff]  ;;  %v2894_v35 = vld [vmem:[%s5886_s2 + $0x178] sm:$0xff]  ;;  %v880_v38 = vld [vmem:[%s5887_s3] sm:$0xff] }
  0x5c   : > { %4151 = vmatpush3.bf16.msra.mxu1 %v4150_v45  ;;  %4125 = vmatprep.subr.bf16.mxu0 %v5902_v0  ;;  %v445_v45 = vld [vmem:[%s5886_s2 + $0x20] sm:$0xff]  ;;  %v5235_v37 = vpack.c.bf16 %v2894_v35, %v2893_v34  ;;  %v881_v40 = vld [vmem:[%s5887_s3 + $0x8] sm:$0xff]  ;;  %vm5278_vm4 = vmpackc.low %vm893_vm2, %vm4742_vm3 }
  0x5d   : > { %4200 = vmatprep.subr.bf16.mxu1 %v5902_v0  ;;  %v5103_v48 = vpack.c.bf16 %v446_v46, %v445_v45  ;;  %v5248_v41 = vpack.c.bf16 %v881_v40, %v880_v38  ;;  %v5262_v46 = vld [vmem:[%s5887_s3 + $0x10] sm:$0xff]  ;;  %v2898_v54 = vld [vmem:[%s5887_s3 + $0x38] sm:$0x3f]  ;;  %v2903_v60 = vld [vmem:[%s5887_s3 + $0x40] sm:$0xff] }
  0x5e   : > { %v2904_v62 = vld [vmem:[%s5887_s3 + $0x48] sm:$0xff]  ;;  %v2911_v15 = vld [vmem:[%s5889_s5 + $0x58] sm:$0xff]  ;;  %v2912_v22 = vld [vmem:[%s5889_s5 + $0x60] sm:$0xff] }
  0x5f   : > { %3468 = vmatmul.mubr.f32.vlgmr.msra.gmra.mrb[0].mxu1 %v4960_v51  ;;  %4127 = vmatpush3.bf16.msra.mxu0 %v4126_v53  ;;  %v2914_v35 = vld [vmem:[%s5889_s5 + $0x70] sm:$0xff]  ;;  %v2915_v38 = vld [vmem:[%s5889_s5 + $0x78] sm:$0xff] }
  0x60   : > { %4202 = vmatpush3.bf16.msra.mxu1 %v4201_v52  ;;  %3572 = vmatprep.mubr.msk.f32.mxu1 %vm4740_vm0, %v5896_v1  ;;  %v448_v52 = vld [vmem:[%s5886_s2 + $0x38] sm:$0xff]  ;;  %v5371_v40 = vpack.c.bf16 %v2915_v38, %v2914_v35 }
  0x61   : > { %4203 = vmatprep.subr.bf16.mxu1 %v5902_v0  ;;  %4152 = vmatprep.subr.bf16.mxu0 %v5902_v0  ;;  %v5113_v53 = vpack.c.bf16 %v448_v52, %v447_v50 }
  0x62   : > { %3433 = vmatmul.mubr.f32.vlgmr.msra.gmra.mrb[0].mxu0 %v4960_v51 }
  0x63   : > { %4154 = vmatpush3.bf16.msra.mxu0 %v4978_v61  ;;  %3502 = vmatprep.mubr.msk.f32.mxu0 %vm4740_vm0, %v5896_v1 }
  0x64   : > { %4205 = vmatpush3.bf16.msra.mxu1 %v4204_v58  ;;  %4155 = vmatprep.subr.bf16.mxu0 %v5902_v0  ;;  %v452_v58 = vld [vmem:[%s5886_s2 + $0x58] sm:$0xff] }
  0x65   : > { %4206 = vmatprep.subr.bf16.mxu1 %v5902_v0  ;;  %v5133_v59 = vpack.c.bf16 %v452_v58, %v451_v57 }
  0x67   : > { %4157 = vmatpush3.bf16.msra.mxu0 %v4992_v5 }
  0x68   : > { %4208 = vmatpush3.bf16.msra.mxu1 %v4207_v2  ;;  %4158 = vmatprep.subr.bf16.mxu0 %v5902_v0  ;;  %v455_v2 = vld [vmem:[%s5886_s2 + $0x70] sm:$0xff] }
  0x69   : > { %4209 = vmatprep.subr.bf16.mxu1 %v5902_v0  ;;  %v5153_v4 = vpack.c.bf16 %v456_v3, %v455_v2  ;;  %v5301_v2 = vpack.c.bf16 %v2904_v62, %v2903_v60  ;;  %v5306_v3 = vld [vmem:[%s5887_s3 + $0x50] sm:$0xff] }
  0x6a   : > { %v2918_v62 = vld [vmem:[%s5889_s5 + $0x90] sm:$0xff] }
  0x6b   : > { %4160 = vmatpush3.bf16.msra.mxu0 %v5007_v11 }
  0x6c   : > { %4211 = vmatpush3.bf16.msra.mxu1 %v4210_v8  ;;  %4161 = vmatprep.subr.bf16.mxu0 %v5902_v0  ;;  %v5163_v8 = vpack.c.bf16 %v2880_v7, %v2879_v6  ;;  %v2906_v6 = vld [vmem:[%s5887_s3 + $0x58] sm:$0x3f] }
  0x6d   : > { %4212 = vmatprep.subr.bf16.mxu1 %v5902_v0 }
  0x6f   : > { %4163 = vmatpush3.bf16.msra.mxu0 %v5020_v17 }
  0x70   : > { %4214 = vmatpush3.bf16.msra.mxu1 %v4213_v14  ;;  %4164 = vmatprep.subr.bf16.mxu0 %v5902_v0  ;;  %v5173_v14 = vpack.c.bf16 %v2882_v10, %v2881_v9  ;;  %v4266_v10 = vpack.c.bf16 %v2906_v6, %v5306_v3  ;;  %v2919_v6 = vld [vmem:[%s5889_s5 + $0x98] sm:$0xff] }
  0x71   : > { %4215 = vmatprep.subr.bf16.mxu1 %v5902_v0 }
  0x73   : > { %4166 = vmatpush3.bf16.msra.mxu0 %v5033_v23 }
  0x74   : > { %4217 = vmatpush3.bf16.msra.mxu1 %v4216_v20  ;;  %4167 = vmatprep.subr.bf16.mxu0 %v5902_v0  ;;  %v2886_v20 = vld [vmem:[%s5886_s2 + $0x138] sm:$0xff] }
  0x75   : > { %4218 = vmatprep.subr.bf16.mxu1 %v5902_v0  ;;  %v5195_v21 = vpack.c.bf16 %v2886_v20, %v2885_v19  ;;  %v2922_v19 = vld [vmem:[%s5889_s5 + $0xa0] sm:$0xff]  ;;  %v2923_v20 = vld [vmem:[%s5889_s5 + $0xa8] sm:$0xff] }
  0x76   : > { %v5343_v24 = vpack.c.bf16 %v2923_v20, %v2922_v19 }
  0x77   : > { %4169 = vmatpush3.bf16.msra.mxu0 %v5046_v29 }
  0x78   : > { %4220 = vmatpush3.bf16.msra.mxu1 %v4219_v26  ;;  %4170 = vmatprep.subr.bf16.mxu0 %v5902_v0  ;;  %v2889_v26 = vld [vmem:[%s5886_s2 + $0x150] sm:$0xff] }
  0x79   : > { %4221 = vmatprep.subr.bf16.mxu1 %v5902_v0  ;;  %v5215_v28 = vpack.c.bf16 %v2890_v27, %v2889_v26  ;;  %v2913_v26 = vld [vmem:[%s5889_s5 + $0x68] sm:$0xff] }
  0x7a   : > { %v5349_v27 = vpack.c.bf16 %v2913_v26, %v2912_v22 }
  0x7b   : > { %4172 = vmatpush3.bf16.msra.mxu0 %v5057_v33 }
  0x7c   : > { %4223 = vmatpush3.bf16.msra.mxu1 %v4222_v32  ;;  %4173 = vmatprep.subr.bf16.mxu0 %v5902_v0  ;;  %v5225_v32 = vpack.c.bf16 %v2892_v31, %v2891_v30  ;;  %v2924_v30 = vld [vmem:[%s5889_s5 + $0xb0] sm:$0xff]  ;;  %v2925_v31 = vld [vmem:[%s5889_s5 + $0xb8] sm:$0xff] }
  0x7d   : > { %4255 = vmatprep.subr.bf16.mxu1 %v5902_v0  ;;  %v5360_v34 = vpack.c.bf16 %v2925_v31, %v2924_v30  ;;  %v5433_v30 = vld [vmem:[%s5888_s4] ss:$0 sm:$0xff] }
  0x7f   : > { %3573 = vmatmul.mubr.f32.vlgmr.msra.gmra.mrb[2].mxu1 %v4960_v51  ;;  %4175 = vmatpush3.bf16.msra.mxu0 %v5067_v36 }
  0x80   : > { %3629 = vmatprep.mubr.msk.f32.mxu1 %vm4740_vm0, %v5896_v1  ;;  %4176 = vmatprep.subr.bf16.mxu0 %v5902_v0 }
  0x81   : > { %4257 = vmatpush3.bf16.msra.mxu1 %v5248_v41 }
  0x82   : > { %4258 = vmatprep.subr.bf16.mxu1 %v5902_v0 }
 0x132   : > { %v539_v42 = vpop.f32.mrb[0].mxu1 }
 0x133   : > { %v3469_v43 = vpop.f32.mrb[1].mxu1  ;;  %3503 = vmatmul.mubr.f32.vlgmr.msra.gmra.mrb[2].mxu0 %v539_v42  ;;  %v2895_v42 = vld [vmem:[%s5887_s3 + $0x20] sm:$0xff] }
 0x134   : > { %4178 = vmatpush3.bf16.msra.mxu0 %v5082_v39  ;;  %3537 = vmatprep.mubr.msk.f32.mxu0 %vm4740_vm0, %v5896_v1  ;;  %v2896_v43 = vld [vmem:[%s5887_s3 + $0x28] sm:$0xff] }
 0x135   : > { %4179 = vmatprep.subr.bf16.mxu0 %v5902_v0  ;;  %v437_v47 = vpop.f32.mrb[0].mxu0  ;;  %v5256_v45 = vpack.c.bf16 %v2896_v43, %v2895_v42  ;;  %v2926_v42 = vld [vmem:[%s5889_s5 + $0xc0] sm:$0xff]  ;;  %v2927_v43 = vld [vmem:[%s5889_s5 + $0xc8] sm:$0xff] }
 0x136   : > { %v3434_v49 = vpop.f32.mrb[1].mxu0 }
 0x137   : > { %v5270_v49 = vld [vmem:[%s5887_s3 + $0x30] sm:$0xff] }
 0x138   : > { %4181 = vmatpush3.bf16.msra.mxu0 %v5091_v44  ;;  %v4252_v55 = vpack.c.bf16 %v2898_v54, %v5270_v49  ;;  %v2917_v54 = vld [vmem:[%s5889_s5 + $0x88] sm:$0xff] }
 0x139   : > { %4182 = vmatprep.subr.bf16.mxu0 %v5902_v0 }
 0x13c   : > { %4184 = vmatpush3.bf16.msra.mxu0 %v5103_v48 }
 0x13d   : > { %4185 = vmatprep.subr.bf16.mxu0 %v5902_v0 }
 0x140   : > { %4187 = vmatpush3.bf16.msra.mxu0 %v5113_v53 }
 0x141   : > { %4188 = vmatprep.subr.bf16.mxu0 %v5902_v0 }
 0x144   : > { %4190 = vmatpush3.bf16.msra.mxu0 %v5123_v56 }
 0x145   : > { %4191 = vmatprep.subr.bf16.mxu0 %v5902_v0 }
 0x148   : > { %4193 = vmatpush3.bf16.msra.mxu0 %v5133_v59 }
 0x149   : > { %4194 = vmatprep.subr.bf16.mxu0 %v5902_v0 }
 0x14c   : > { %4196 = vmatpush3.bf16.msra.mxu0 %v5143_v63 }
 0x14d   : > { %4197 = vmatprep.subr.bf16.mxu0 %v5902_v0 }
 0x150   : > { %4199 = vmatpush3.bf16.msra.mxu0 %v5153_v4 }
 0x151   : > { %4224 = vmatprep.subr.bf16.mxu0 %v5902_v0 }
 0x152   : > { %v782_v12 = vpop.f32.mrb[2].mxu1 }
 0x153   : > { %3538 = vmatmul.mubr.f32.vlgmr.msra.gmra.mrb[2].mxu0 %v437_v47  ;;  %v3574_v13 = vpop.f32.mrb[3].mxu1  ;;  %v883_v47 = vld [vmem:[%s5887_s3 + $0x18] sm:$0x3f] }
 0x154   : > { %4226 = vmatpush3.bf16.msra.mxu0 %v5163_v8  ;;  %3607 = vmatprep.mubr.msk.f32.mxu0 %vm4740_vm0, %v5896_v1  ;;  %v4259_v52 = vpack.c.bf16 %v883_v47, %v5262_v46  ;;  %v2910_v13 = vld [vmem:[%s5889_s5 + $0x50] sm:$0xff]  ;;  %v5380_v47 = vpack.c.bf16 %v2927_v43, %v2926_v42  ;;  %v1141_v43 = vld [vmem:[%s5889_s5] sm:$0xff] }
 0x155   : > { %4227 = vmatprep.subr.bf16.mxu0 %v5902_v0  ;;  %v5332_v16 = vpack.c.bf16 %v2911_v15, %v2910_v13 }
 0x156   : > { %4261 = vmatpush3.bf16.msk.msra.mxu1 %vm5278_vm4, %v4259_v52  ;;  %v2916_v52 = vld [vmem:[%s5889_s5 + $0x80] sm:$0xff] }
 0x157   : > { %4262 = vmatprep.subr.bf16.mxu1 %v5902_v0 }
 0x158   : > { %4229 = vmatpush3.bf16.msra.mxu0 %v5173_v14 }
 0x159   : > { %4230 = vmatprep.subr.bf16.mxu0 %v5902_v0 }
 0x15c   : > { %4232 = vmatpush3.bf16.msra.mxu0 %v5185_v18 }
 0x15d   : > { %4233 = vmatprep.subr.bf16.mxu0 %v5902_v0 }
 0x160   : > { %4235 = vmatpush3.bf16.msra.mxu0 %v5195_v21 }
 0x161   : > { %4236 = vmatprep.subr.bf16.mxu0 %v5902_v0 }
 0x164   : > { %4238 = vmatpush3.bf16.msra.mxu0 %v5205_v25 }
 0x165   : > { %4239 = vmatprep.subr.bf16.mxu0 %v5902_v0 }
 0x168   : > { %4241 = vmatpush3.bf16.msra.mxu0 %v5215_v28 }
 0x169   : > { %4242 = vmatprep.subr.bf16.mxu0 %v5902_v0 }
 0x16c   : > { %4244 = vmatpush3.bf16.msra.mxu0 %v5225_v32 }
 0x16d   : > { %4245 = vmatprep.subr.bf16.mxu0 %v5902_v0 }
 0x170   : > { %4247 = vmatpush3.bf16.msra.mxu0 %v5235_v37 }
 0x171   : > { %4248 = vmatprep.subr.bf16.mxu0 %v5902_v0 }
 0x173   : > { %3608 = vmatmul.mubr.f32.vlgmr.msra.gmra.mrb[2].mxu0 %v782_v12 }
 0x174   : > { %3618 = vmatprep.mubr.msk.f32.mxu0 %vm4740_vm0, %v5896_v1  ;;  %4250 = vmatpush3.bf16.msra.mxu0 %v5256_v45 }
 0x175   : > { %4251 = vmatprep.subr.bf16.mxu0 %v5902_v0 }
 0x178   : > { %4254 = vmatpush3.bf16.msk.msra.mxu0 %vm5278_vm4, %v4252_v55  ;;  %v5391_v55 = vpack.c.bf16 %v2917_v54, %v2916_v52  ;;  %v1142_v52 = vld [vmem:[%s5889_s5 + $0x8] sm:$0xff] }
 0x179   : > { %4299 = vmatprep.subr.bf16.mxu0 %v5902_v0  ;;  %v5443_v54 = vpack.c.bf16 %v1142_v52, %v1141_v43  ;;  %v1405_v52 = vld [vmem:[%s5891_s7 + $0x10] sm:$0xff] }
 0x246   : > { %v869_v57 = vpop.f32.mrb[2].mxu0 }
 0x247   : > { %875 = vst.msk [vmem:[#allocation2 + $0x1] sm:$0xff] %vm874_vm5, %v869_v57  ;;  %v3609_v58 = vpop.f32.mrb[3].mxu0  ;;  %v2928_v57 = vld [vmem:[%s5889_s5 + $0xd0] sm:$0xff] }
 0x248   : > { %v2929_v58 = vld [vmem:[%s5889_s5 + $0xd8] sm:$0xff] }
 0x249   : > { %v5400_v60 = vpack.c.bf16 %v2929_v58, %v2928_v57  ;;  %v1143_v57 = vld [vmem:[%s5889_s5 + $0x10] sm:$0xff]  ;;  %v1144_v58 = vld [vmem:[%s5889_s5 + $0x18] sm:$0xff] }
 0x24e   : > { %v884_v7 = vld [vmem:[#allocation2 + $0x1] sm:$0xff] }
 0x24f   : > { %v879_v9 = vld [vmem:[#allocation2] sm:$0xff]  ;;  %3619 = vmatmul.mubr.msk.f32.vlgmr.msra.gmra.mrb[4].mxu0 %vm874_vm5, %v884_v7 }
 0x250   : > { %3630 = vmatmul.mubr.msk.f32.vlgmr.msra.gmra.mrb[4].mxu1 %vm874_vm5, %v879_v9  ;;  %3709 = vmatprep.mubr.msk.f32.mxu0 %vm4740_vm0, %v5896_v1  ;;  %v1043_v12 = vld [vmem:[#allocation2 + $0x2] sm:$0xff]  ;;  %v5414_v9 = vpack.c.bf16 %v2919_v6, %v2918_v62 }
 0x251   : > { %4264 = vmatpush3.bf16.msra.mxu1 %v5301_v2  ;;  %3640 = vmatprep.mubr.msk.f32.mxu1 %vm4740_vm0, %v5896_v1  ;;  %v2930_v7 = vld [vmem:[%s5889_s5 + $0xe0] sm:$0xff] }
 0x252   : > { %4265 = vmatprep.subr.bf16.mxu1 %v5902_v0  ;;  %4301 = vmatpush3.bf16.msra.mxu0 %v5343_v24 }
 0x253   : > { %4302 = vmatprep.subr.bf16.mxu0 %v5902_v0 }
 0x255   : > { %4268 = vmatpush3.bf16.msk.msra.mxu1 %vm5278_vm4, %v4266_v10  ;;  %v2931_v10 = vld [vmem:[%s5889_s5 + $0xe8] sm:$0xff] }
 0x256   : > { %4269 = vmatprep.subr.bf16.mxu1 %v5902_v0  ;;  %4304 = vmatpush3.bf16.msra.mxu0 %v5360_v34 }
 0x257   : > { %4305 = vmatprep.subr.bf16.mxu0 %v5902_v0 }
 0x258   : > { %3641 = vmatmul.mubr.msk.f32.vlgmr.msra.gmra.mrb[6].mxu1 %vm874_vm5, %v1043_v12  ;;  %v5424_v12 = vpack.c.bf16 %v2931_v10, %v2930_v7  ;;  %v5454_v7 = vpack.c.bf16 %v1144_v58, %v1143_v57  ;;  %v1145_v10 = vld [vmem:[%s5889_s5 + $0x20] sm:$0xff]  ;;  %v1406_v57 = vld [vmem:[%s5891_s7 + $0x18] sm:$0xff] }
 0x259   : > { %3663 = vmatprep.mubr.msk.f32.mxu1 %vm4740_vm0, %v5896_v1  ;;  %4271 = vmatpush3.bf16.msra.mxu1 %v5332_v16 }
 0x25a   : > { %4272 = vmatprep.subr.bf16.mxu1 %v5902_v0  ;;  %4307 = vmatpush3.bf16.msra.mxu0 %v5380_v47 }
 0x25b   : > { %4308 = vmatprep.subr.bf16.mxu0 %v5902_v0 }
 0x25d   : > { %4274 = vmatpush3.bf16.msra.mxu1 %v5349_v27 }
 0x25e   : > { %4275 = vmatprep.subr.bf16.mxu1 %v5902_v0  ;;  %4310 = vmatpush3.bf16.msra.mxu0 %v5400_v60 }
 0x25f   : > { %4311 = vmatprep.subr.bf16.mxu0 %v5902_v0 }
 0x261   : > { %4277 = vmatpush3.bf16.msra.mxu1 %v5371_v40 }
 0x262   : > { %4278 = vmatprep.subr.bf16.mxu1 %v5902_v0  ;;  %4313 = vmatpush3.bf16.msra.mxu0 %v5424_v12 }
 0x263   : > { %3747 = vmatprep.subr.mxu0 %v5896_v1 }
 0x265   : > { %4280 = vmatpush3.bf16.msra.mxu1 %v5391_v55 }
 0x266   : > { %4281 = vmatprep.subr.bf16.mxu1 %v5902_v0 }
 0x269   : > { %4283 = vmatpush3.bf16.msra.mxu1 %v5414_v9 }
 0x26a   : > { %4284 = vmatprep.subr.bf16.mxu1 %v5902_v0 }
 0x322   : > { %v963_v13 = vpop.f32.mrb[4].mxu0 }
 0x323   : > { %v1039_v15 = vpop.f32.mrb[4].mxu1  ;;  %v3620_v20 = vpop.f32.mrb[5].mxu0 }
 0x324   : > { %v1040_v19 = vadd.f32 %v1039_v15, %v963_v13  ;;  %v3631_v22 = vpop.f32.mrb[5].mxu1  ;;  %v1146_v13 = vld [vmem:[%s5889_s5 + $0x28] sm:$0xff]  ;;  %v1148_v20 = vld [vmem:[%s5889_s5 + $0x38] sm:$0xff] }
 0x325   : > { %v5468_v15 = vpack.c.bf16 %v1146_v13, %v1145_v10  ;;  %v1408_v10 = vld [vmem:[%s5891_s7 + $0x28] sm:$0xff]  ;;  %v1409_v13 = vld [vmem:[%s5891_s7 + $0x30] sm:$0xff] }
 0x32b   : > { %v1121_v26 = vpop.f32.mrb[6].mxu1 }
 0x32c   : > { %v1125_v31 = vadd.f32 %v1121_v26, %v1040_v19  ;;  %v3642_v35 = vpop.f32.mrb[7].mxu1  ;;  %v1147_v19 = vld [vmem:[%s5889_s5 + $0x30] sm:$0xff]  ;;  %v1149_v26 = vld [vmem:[%s5889_s5 + $0x40] sm:$0xff] }
 0x32d   : > { %v5478_v22 = vpack.c.bf16 %v1148_v20, %v1147_v19  ;;  %v1410_v20 = vld [vmem:[%s5891_s7 + $0x38] sm:$0xff] }
 0x32e   : > { %v1133_v38 = vadd.f32 %v5433_v30, %v1125_v31  ;;  %v1150_v31 = vld [vmem:[%s5889_s5 + $0x48] sm:$0xff] }
 0x32f   : > { %v5488_v35 = vpack.c.bf16 %v1150_v31, %v1149_v26  ;;  %v5531_v26 = vpack.c.bf16 %v1410_v20, %v1409_v13  ;;  %v1411_v31 = vld [vmem:[%s5891_s7 + $0x40] sm:$0xff]  ;;  %v1417_v20 = vld [vmem:[%s5891_s7 + $0x70] sm:$0xff] }
 0x330   : > { %v1134_v42 = vmax.f32 %v1133_v38, 0.0  ;;  %v1403_v38 = vld [vmem:[%s5891_s7] sm:$0xff] }
 0x331   : > { %5916 = vst [vmem:[#allocation13_spill] sm:$0xff] %v5531_v26 }
 0x332   : > { %1136 = vst.msk [vmem:[#allocation3 + $0x1] sm:$0xff] %vm1135_vm7, %v1134_v42  ;;  %v1404_v42 = vld [vmem:[%s5891_s7 + $0x8] sm:$0xff] }
 0x333   : > { %v5498_v43 = vpack.c.bf16 %v1404_v42, %v1403_v38  ;;  %v1412_v38 = vld [vmem:[%s5891_s7 + $0x48] sm:$0xff] }
 0x334   : > { %v5541_v42 = vpack.c.bf16 %v1412_v38, %v1411_v31  ;;  %v1418_v31 = vld [vmem:[%s5891_s7 + $0x78] sm:$0xff] }
 0x335   : > { %v5572_v38 = vpack.c.bf16 %v1418_v31, %v1417_v20  ;;  %v5581_v20 = vld [vmem:[%s5890_s6] ss:$0 sm:$0xff] }
 0x336   : > { %5917 = vst [vmem:[#allocation14_spill] sm:$0xff] %v5541_v42  ;;  %5921 = vst [vmem:[#allocation18_spill] sm:$0xff] %v5581_v20 }
 0x337   : > { %5920 = vst [vmem:[#allocation17_spill] sm:$0xff] %v5572_v38 }
 0x339   : > { %v1151_v62 = vld [vmem:[#allocation3 + $0x1] sm:$0xff] }
 0x33a   : > { %v1309_v6 = vld [vmem:[#allocation3 + $0x2] sm:$0xff]  ;;  %3664 = vmatmul.mubr.msk.f32.vlgmr.msra.gmra.mrb[8].mxu1 %vm1135_vm7, %v1151_v62  ;;  %v5509_v62 = vpack.c.bf16 %v1406_v57, %v1405_v52  ;;  %v1413_v52 = vld [vmem:[%s5891_s7 + $0x50] sm:$0xff]  ;;  %v1414_v57 = vld [vmem:[%s5891_s7 + $0x58] sm:$0xff] }
 0x33b   : > { %3710 = vmatmul.mubr.msk.f32.vlgmr.msra.gmra.mrb[6].mxu0 %vm1135_vm7, %v1309_v6  ;;  %4286 = vmatpush3.bf16.msra.mxu1 %v5443_v54  ;;  %v1140_v58 = vld [vmem:[#allocation3] sm:$0xff] }
 0x33c   : > { %3686 = vmatprep.mubr.msk.f32.mxu1 %vm4740_vm0, %v5896_v1  ;;  %4287 = vmatprep.subr.bf16.mxu1 %v5902_v0  ;;  %v1407_v6 = vld [vmem:[%s5891_s7 + $0x20] sm:$0xff] }
 0x33d   : > { %3749 = vmatprep.mubr.msk.f32.mxu0 %vm4740_vm0, %v5896_v1  ;;  %v5525_v19 = vpack.c.bf16 %v1408_v10, %v1407_v6  ;;  %v1415_v6 = vld [vmem:[%s5891_s7 + $0x60] sm:$0xff]  ;;  %v1416_v10 = vld [vmem:[%s5891_s7 + $0x68] sm:$0xff] }
 0x33e   : > { %v5562_v13 = vpack.c.bf16 %v1416_v10, %v1415_v6 }
 0x33f   : > { %4289 = vmatpush3.bf16.msra.mxu1 %v5454_v7  ;;  %5915 = vst [vmem:[#allocation12_spill] sm:$0xff] %v5525_v19 }
 0x340   : > { %4290 = vmatprep.subr.bf16.mxu1 %v5902_v0  ;;  %5919 = vst [vmem:[#allocation16_spill] sm:$0xff] %v5562_v13 }
 0x343   : > { %4292 = vmatpush3.bf16.msra.mxu1 %v5468_v15 }
 0x344   : > { %4293 = vmatprep.subr.bf16.mxu1 %v5902_v0 }
 0x347   : > { %4295 = vmatpush3.bf16.msra.mxu1 %v5478_v22 }
 0x348   : > { %4296 = vmatprep.subr.bf16.mxu1 %v5902_v0 }
 0x34b   : > { %4298 = vmatpush3.bf16.msra.mxu1 %v5488_v35 }
 0x34c   : > { %4314 = vmatprep.subr.bf16.mxu1 %v5902_v0 }
 0x34e   : > { %3687 = vmatmul.mubr.msk.f32.vlgmr.msra.gmra.mrb[10].mxu1 %vm1135_vm7, %v1140_v58  ;;  %v5551_v58 = vpack.c.bf16 %v1414_v57, %v1413_v52 }
 0x34f   : > { %4316 = vmatpush3.bf16.msra.mxu1 %v5498_v43  ;;  %3744 = vmatprep.mubr.msk.f32.mxu1 %vm4740_vm0, %v5896_v1 }
 0x350   : > { %4317 = vmatprep.subr.bf16.mxu1 %v5902_v0  ;;  %5918 = vst [vmem:[#allocation15_spill] sm:$0xff] %v5551_v58 }
 0x353   : > { %4319 = vmatpush3.bf16.msra.mxu1 %v5509_v62 }
 0x354   : > { %4320 = vmatprep.subr.bf16.mxu1 %v5902_v0 }
 0x357   : > { %4322 = vmatpush3.bf16.msra.mxu1 %v5525_v19  ;;  %v2955_v19 = vld [vmem:[%s4898_s22 + $0x220] sm:$0xff] }
 0x358   : > { %4323 = vmatprep.subr.bf16.mxu1 %v5902_v0 }
 0x35b   : > { %4325 = vmatpush3.bf16.msra.mxu1 %v5531_v26  ;;  %v2952_v26 = vld [vmem:[%s4898_s22 + $0x208] sm:$0xff] }
 0x35c   : > { %4326 = vmatprep.subr.bf16.mxu1 %v5902_v0 }
 0x35f   : > { %4328 = vmatpush3.bf16.msra.mxu1 %v5541_v42  ;;  %v2951_v42 = vld [vmem:[%s4898_s22 + $0x200] sm:$0xff] }
 0x360   : > { %4329 = vmatprep.subr.bf16.mxu1 %v5902_v0 }
 0x363   : > { %4331 = vmatpush3.bf16.msra.mxu1 %v5551_v58 }
 0x364   : > { %4332 = vmatprep.subr.bf16.mxu1 %v5902_v0 }
 0x367   : > { %4334 = vmatpush3.bf16.msra.mxu1 %v5562_v13 }
 0x368   : > { %4335 = vmatprep.subr.bf16.mxu1 %v5902_v0 }
 0x36b   : > { %4337 = vmatpush3.bf16.msra.mxu1 %v5572_v38 }
 0x36c   : > { %4362 = vmatprep.subr.bf16.mxu1 %v5902_v0  ;;  %v4363_v0 = vpack.c.bf16 %v2952_v26, %v2951_v42  ;;  %v2957_v42 = vld [vmem:[%s4898_s22 + $0x230] sm:$0xff] }
 0x40d   : > { %v1232_v52 = vpop.f32.mrb[8].mxu1 }
 0x40e   : > { %v1390_v57 = vpop.f32.mrb[6].mxu0  ;;  %v3665_v6 = vpop.f32.mrb[9].mxu1 }
 0x40f   : > { %v3711_v10 = vpop.f32.mrb[7].mxu0  ;;  %v2953_v6 = vld [vmem:[%s4898_s22 + $0x210] sm:$0xff] }
 0x410   : > { %v2954_v10 = vld [vmem:[%s4898_s22 + $0x218] sm:$0xff] }
 0x421   : > { %v1305_v1 = vpop.f32.mrb[10].mxu1 }
 0x422   : > { %v1306_v13 = vadd.f32 %v1305_v1, %v1232_v52  ;;  %v3688_v58 = vpop.f32.mrb[11].mxu1  ;;  %v4366_v1 = vpack.c.bf16 %v2954_v10, %v2953_v6  ;;  %v5923_v52 = vmov 0.0|0.0   ;;  %v2961_v10 = vld [vmem:[%s4898_s22 + $0x250] sm:$0xff] }
 0x423   : > { %v5922_v58 = vmov 0.0  }
 0x424   : > { %v1394_v31 = vadd.f32 %v1390_v57, %v1306_v13  ;;  %v2956_v13 = vld [vmem:[%s4898_s22 + $0x228] sm:$0xff]  ;;  %v2959_v57 = vld [vmem:[%s4898_s22 + $0x240] sm:$0xff] }
 0x425   : > { %v4369_v26 = vpack.c.bf16 %v2956_v13, %v2955_v19  ;;  %v2962_v19 = vld [vmem:[%s4898_s22 + $0x258] sm:$0xff]  ;;  %v2963_v13 = vld [vmem:[%s4898_s22 + $0x260] sm:$0xff] }
 0x426   : > { %v1402_v38 = vadd.f32 %v5581_v20, %v1394_v31  ;;  %v2960_v31 = vld [vmem:[%s4898_s22 + $0x248] sm:$0xff]  ;;  %v2998_v20 = vld [vmem:[%s4898_s22 + $0x2f8] sm:$0xff] }
 0x427   : > { %v4375_v6 = vpack.c.bf16 %v2960_v31, %v2959_v57  ;;  %v2983_v31 = vld [vmem:[%s4898_s22 + $0x280] sm:$0xff] }
 0x428   : > { %3745 = vmatmul.mubr.f32.vlgmr.msra.gmra.mrb[12].mxu1 %v1402_v38  ;;  %v2958_v38 = vld [vmem:[%s4898_s22 + $0x238] sm:$0xff] }
 0x429   : > { %4364 = vmatpush3.bf16.msra.mxu1 %v4363_v0  ;;  %3819 = vmatprep.mubr.msk.f32.mxu1 %vm4740_vm0, %v5922_v58  ;;  %v4372_v0 = vpack.c.bf16 %v2958_v38, %v2957_v42  ;;  %v2965_v38 = vld [vmem:[%s4898_s22 + $0x270] sm:$0xff] }
 0x42a   : > { %4365 = vmatprep.subr.bf16.mxu1 %v5923_v52 }
 0x42d   : > { %4367 = vmatpush3.bf16.msra.mxu1 %v4366_v1  ;;  %v4378_v1 = vpack.c.bf16 %v2962_v19, %v2961_v10  ;;  %v2985_v19 = vld [vmem:[%s4898_s22 + $0x290] sm:$0xff] }
 0x42e   : > { %4368 = vmatprep.subr.bf16.mxu1 %v5923_v52 }
 0x431   : > { %4370 = vmatpush3.bf16.msra.mxu1 %v4369_v26  ;;  %v2964_v26 = vld [vmem:[%s4898_s22 + $0x268] sm:$0xff] }
 0x432   : > { %4371 = vmatprep.subr.bf16.mxu1 %v5923_v52  ;;  %v4381_v42 = vpack.c.bf16 %v2964_v26, %v2963_v13  ;;  %v2987_v13 = vld [vmem:[%s4898_s22 + $0x2a0] sm:$0xff] }
 0x435   : > { %4373 = vmatpush3.bf16.msra.mxu1 %v4372_v0  ;;  %v2966_v0 = vld [vmem:[%s4898_s22 + $0x278] sm:$0xff] }
 0x436   : > { %4374 = vmatprep.subr.bf16.mxu1 %v5923_v52  ;;  %v4384_v57 = vpack.c.bf16 %v2966_v0, %v2965_v38  ;;  %v2989_v0 = vld [vmem:[%s4898_s22 + $0x2b0] sm:$0xff] }
 0x439   : > { %4376 = vmatpush3.bf16.msra.mxu1 %v4375_v6  ;;  %v2984_v6 = vld [vmem:[%s4898_s22 + $0x288] sm:$0xff] }
 0x43a   : > { %4377 = vmatprep.subr.bf16.mxu1 %v5923_v52  ;;  %v4435_v10 = vpack.c.bf16 %v2984_v6, %v2983_v31  ;;  %v2991_v6 = vld [vmem:[%s4898_s22 + $0x2c0] sm:$0xff] }
 0x43d   : > { %4379 = vmatpush3.bf16.msra.mxu1 %v4378_v1  ;;  %v2986_v1 = vld [vmem:[%s4898_s22 + $0x298] sm:$0xff] }
 0x43e   : > { %4380 = vmatprep.subr.bf16.mxu1 %v5923_v52  ;;  %v4438_v26 = vpack.c.bf16 %v2986_v1, %v2985_v19  ;;  %v2993_v1 = vld [vmem:[%s4898_s22 + $0x2d0] sm:$0xff] }
 0x441   : > { %4382 = vmatpush3.bf16.msra.mxu1 %v4381_v42  ;;  %v2988_v42 = vld [vmem:[%s4898_s22 + $0x2a8] sm:$0xff] }
 0x442   : > { %4383 = vmatprep.subr.bf16.mxu1 %v5923_v52  ;;  %v4441_v38 = vpack.c.bf16 %v2988_v42, %v2987_v13  ;;  %v2994_v13 = vld [vmem:[%s4898_s22 + $0x2d8] sm:$0xff]  ;;  %v2995_v42 = vld [vmem:[%s4898_s22 + $0x2e0] sm:$0xff] }
 0x445   : > { %4385 = vmatpush3.bf16.msra.mxu1 %v4384_v57  ;;  %v2990_v57 = vld [vmem:[%s4898_s22 + $0x2b8] sm:$0xff] }
 0x446   : > { %4434 = vmatprep.subr.bf16.mxu1 %v5923_v52  ;;  %v4444_v31 = vpack.c.bf16 %v2990_v57, %v2989_v0  ;;  %v2997_v57 = vld [vmem:[%s4898_s22 + $0x2f0] sm:$0xff] }
 0x448   : > { %3820 = vmatmul.mubr.f32.vlgmr.msra.gmra.mrb[14].mxu1 %v4960_v51 }
 0x449   : > { %3924 = vmatprep.mubr.msk.f32.mxu1 %vm4740_vm0, %v5922_v58  ;;  %4436 = vmatpush3.bf16.msra.mxu1 %v4435_v10  ;;  %v2992_v10 = vld [vmem:[%s4898_s22 + $0x2c8] sm:$0xff] }
 0x44a   : > { %4437 = vmatprep.subr.bf16.mxu1 %v5923_v52  ;;  %v4447_v19 = vpack.c.bf16 %v2992_v10, %v2991_v6  ;;  %v2935_v6 = vld [vmem:[%s4898_s22 + $0x180] sm:$0xff]  ;;  %v2936_v10 = vld [vmem:[%s4898_s22 + $0x188] sm:$0xff] }
 0x44d   : > { %4439 = vmatpush3.bf16.msra.mxu1 %v4438_v26  ;;  %v4450_v26 = vpack.c.bf16 %v2994_v13, %v2993_v1 }
 0x44e   : > { %4440 = vmatprep.subr.bf16.mxu1 %v5923_v52 }
 0x451   : > { %4442 = vmatpush3.bf16.msra.mxu1 %v4441_v38  ;;  %v2996_v38 = vld [vmem:[%s4898_s22 + $0x2e8] sm:$0xff] }
 0x452   : > { %4443 = vmatprep.subr.bf16.mxu1 %v5923_v52  ;;  %v4453_v0 = vpack.c.bf16 %v2996_v38, %v2995_v42  ;;  %v2939_v42 = vld [vmem:[%s4898_s22 + $0x1a0] sm:$0xff]  ;;  %v2940_v38 = vld [vmem:[%s4898_s22 + $0x1a8] sm:$0xff] }
 0x455   : > { %4445 = vmatpush3.bf16.msra.mxu1 %v4444_v31  ;;  %v4456_v31 = vpack.c.bf16 %v2998_v20, %v2997_v57  ;;  %v1489_v20 = vld [vmem:[%s5892_s8] sm:$0xf]  ;;  %v2941_v57 = vld [vmem:[%s4898_s22 + $0x1b0] sm:$0xff] }
 0x456   : > { %4446 = vmatprep.subr.bf16.mxu1 %v5923_v52 }
 0x459   : > { %4448 = vmatpush3.bf16.msra.mxu1 %v4447_v19  ;;  %v4339_v19 = vpack.c.bf16 %v2936_v10, %v2935_v6  ;;  %v2943_v10 = vld [vmem:[%s4898_s22 + $0x1c0] sm:$0xff] }
 0x45a   : > { %4449 = vmatprep.subr.bf16.mxu1 %v5923_v52 }
 0x45d   : > { %4451 = vmatpush3.bf16.msra.mxu1 %v4450_v26 }
 0x45e   : > { %4452 = vmatprep.subr.bf16.mxu1 %v5923_v52 }
 0x461   : > { %4454 = vmatpush3.bf16.msra.mxu1 %v4453_v0  ;;  %v4345_v0 = vpack.c.bf16 %v2940_v38, %v2939_v42  ;;  %v2949_v38 = vld [vmem:[%s4898_s22 + $0x1f0] sm:$0xff] }
 0x462   : > { %4455 = vmatprep.subr.bf16.mxu1 %v5923_v52 }
 0x465   : > { %4457 = vmatpush3.bf16.msra.mxu1 %v4456_v31  ;;  %v2942_v31 = vld [vmem:[%s4898_s22 + $0x1b8] sm:$0xff] }
 0x466   : > { %4482 = vmatprep.subr.bf16.mxu1 %v5923_v52  ;;  %v4348_v6 = vpack.c.bf16 %v2942_v31, %v2941_v57 }
 0x468   : > { %3925 = vmatmul.mubr.f32.vlgmr.msra.gmra.mrb[16].mxu1 %v4960_v51  ;;  %v2937_v51 = vld [vmem:[%s4898_s22 + $0x190] sm:$0xff] }
 0x469   : > { %4484 = vmatpush3.bf16.msra.mxu1 %v5256_v45  ;;  %3970 = vmatprep.mubr.msk.f32.mxu1 %vm4740_vm0, %v5922_v58  ;;  %v2938_v45 = vld [vmem:[%s4898_s22 + $0x198] sm:$0xff] }
 0x46a   : > { %4485 = vmatprep.subr.bf16.mxu1 %v5923_v52  ;;  %v4342_v26 = vpack.c.bf16 %v2938_v45, %v2937_v51  ;;  %v2946_v51 = vld [vmem:[%s4898_s22 + $0x1d8] sm:$0xff] }
 0x4fb   : > { %v1485_v1 = vpop.f32.mrb[12].mxu1 }
 0x4fc   : > { %v3746_v13 = vpop.f32.mrb[13].mxu1  ;;  %3748 = vmatpush3.msra.mxu0 %v1485_v1  ;;  %v2945_v1 = vld [vmem:[%s4898_s22 + $0x1d0] sm:$0xff] }
 0x4fd   : > { %3750 = vmatmul.mubr.msk.f32.vlgmr.msra.gmra.mrb[8].mxu0 %vm1490_vm8, %v1489_v20  ;;  %4338 = vmatprep.subr.bf16.mxu0 %v5923_v52  ;;  %v2944_v20 = vld [vmem:[%s4898_s22 + $0x1c8] sm:$0xff]  ;;  %v4354_v45 = vpack.c.bf16 %v2946_v51, %v2945_v1  ;;  %v2947_v13 = vld [vmem:[%s4898_s22 + $0x1e0] sm:$0xff] }
 0x4fe   : > { %4340 = vmatpush3.bf16.msra.mxu0 %v4339_v19  ;;  %3784 = vmatprep.mubr.msk.f32.mxu0 %vm4740_vm0, %v5922_v58  ;;  %v4351_v19 = vpack.c.bf16 %v2944_v20, %v2943_v10  ;;  %v4637_v10 = vld [vmem:[%s5885_s1] sm:$0xff] }
 0x4ff   : > { %4341 = vmatprep.subr.bf16.mxu0 %v5923_v52 }
 0x502   : > { %4343 = vmatpush3.bf16.msra.mxu0 %v4342_v26  ;;  %v2948_v26 = vld [vmem:[%s4898_s22 + $0x1e8] sm:$0xff] }
 0x503   : > { %4344 = vmatprep.subr.bf16.mxu0 %v5923_v52  ;;  %v4357_v42 = vpack.c.bf16 %v2948_v26, %v2947_v13 }
 0x506   : > { %4346 = vmatpush3.bf16.msra.mxu0 %v4345_v0  ;;  %v2950_v0 = vld [vmem:[%s4898_s22 + $0x1f8] sm:$0xff]  ;;  %s2862_s22 = sshll.u32 %s4894_s23, 3 }
 0x507   : > { %4347 = vmatprep.subr.bf16.mxu0 %v5923_v52  ;;  %v4360_v57 = vpack.c.bf16 %v2950_v0, %v2949_v38  ;;  %s5711_s29 = scalar_lea.vmem [#allocation7], %s2862_s22 }
 0x508   : > { %s2782_s14 = sshll.u32 %s5711_s29, 4  ;;  %s5833_s14 = int_to_ptr.vmem [resolvable:$true] %s2782_s14 }
 0x509   : > { %s4668_s17 = scalar_lea.vmem %s5833_s14, 128  ;;  %p4675_p8 = scmp.lt.s32.totalorder %s5833_s14, %s4673_s25 }
 0x50a   : > { %4349 = vmatpush3.bf16.msra.mxu0 %v4348_v6  ;;  %p4669_p6 = scmp.ne.s32.totalorder %s5833_s14, %s4668_s17  ;;  %p4676_p10 = scmp.lt.s32.totalorder %s4674_s26, %s4668_s17 }
 0x50b   : > { %4350 = vmatprep.subr.bf16.mxu0 %v5923_v52 }
 0x50c   : > { %p4670_p12 = pnand %p4669_p6, %p5931_p11  ;;  %p4677_p0 = por %p4676_p10, %p4675_p8 }
 0x50e   : > { %4352 = vmatpush3.bf16.msra.mxu0 %v4351_v19  ;;  %p4671_p13 = pneg %p4670_p12 }
 0x50f   : > { %4353 = vmatprep.subr.bf16.mxu0 %v5923_v52 }
 0x510   : > { %p4678_p2 = pnand %p4677_p0, %p4671_p13 }
 0x512   : > { %4355 = vmatpush3.bf16.msra.mxu0 %v4354_v45 }
 0x513   : > { %4356 = vmatprep.subr.bf16.mxu0 %v5923_v52 }
 0x516   : > { %4358 = vmatpush3.bf16.msra.mxu0 %v4357_v42 }
 0x517   : > { %4359 = vmatprep.subr.bf16.mxu0 %v5923_v52 }
 0x51a   : > { %4361 = vmatpush3.bf16.msra.mxu0 %v4360_v57 }
 0x51b   : > { %4386 = vmatprep.subr.bf16.mxu0 %v5923_v52  ;;  %v1751_v31 = vpop.f32.mrb[14].mxu1 }
 0x51c   : > { %v3821_v6 = vpop.f32.mrb[15].mxu1 }
 0x51d   : > { %3785 = vmatmul.mubr.f32.vlgmr.msra.gmra.mrb[10].mxu0 %v4637_v10 }
 0x51e   : > { %4388 = vmatpush3.bf16.msra.mxu0 %v4978_v61  ;;  %3854 = vmatprep.mubr.msk.f32.mxu0 %vm4740_vm0, %v5922_v58 }
 0x51f   : > { %4389 = vmatprep.subr.bf16.mxu0 %v5923_v52 }
 0x522   : > { %4391 = vmatpush3.bf16.msra.mxu0 %v4992_v5 }
 0x523   : > { %4392 = vmatprep.subr.bf16.mxu0 %v5923_v52 }
 0x526   : > { %4394 = vmatpush3.bf16.msra.mxu0 %v5007_v11 }
 0x527   : > { %4395 = vmatprep.subr.bf16.mxu0 %v5923_v52 }
 0x52a   : > { %4397 = vmatpush3.bf16.msra.mxu0 %v5020_v17 }
 0x52b   : > { %4398 = vmatprep.subr.bf16.mxu0 %v5923_v52 }
 0x52e   : > { %4400 = vmatpush3.bf16.msra.mxu0 %v5033_v23 }
 0x52f   : > { %4401 = vmatprep.subr.bf16.mxu0 %v5923_v52 }
 0x532   : > { %4403 = vmatpush3.bf16.msra.mxu0 %v5046_v29 }
 0x533   : > { %4404 = vmatprep.subr.bf16.mxu0 %v5923_v52 }
 0x536   : > { %4406 = vmatpush3.bf16.msra.mxu0 %v5057_v33  ;;  %v3018_v33 = vld [vmem:[%s5887_s3 + $0x38] sm:$0x3f] }
 0x537   : > { %4407 = vmatprep.subr.bf16.mxu0 %v5923_v52 }
 0x53a   : > { %4409 = vmatpush3.bf16.msra.mxu0 %v5067_v36  ;;  %v4486_v36 = vpack.c.bf16 %v3018_v33, %v5270_v49 }
 0x53b   : > { %4410 = vmatprep.subr.bf16.mxu0 %v5923_v52  ;;  %v1993_v61 = vpop.f32.mrb[16].mxu1 }
 0x53c   : > { %v3926_v5 = vpop.f32.mrb[17].mxu1  ;;  %4488 = vmatpush3.bf16.msk.msra.mxu1 %vm5278_vm4, %v4486_v36 }
 0x53d   : > { %3855 = vmatmul.mubr.f32.vlgmr.msra.gmra.mrb[12].mxu0 %v1751_v31  ;;  %4489 = vmatprep.subr.bf16.mxu1 %v5923_v52 }
 0x53e   : > { %4412 = vmatpush3.bf16.msra.mxu0 %v5082_v39  ;;  %3889 = vmatprep.mubr.msk.f32.mxu0 %vm4740_vm0, %v5922_v58 }
 0x53f   : > { %4413 = vmatprep.subr.bf16.mxu0 %v5923_v52 }
 0x542   : > { %4415 = vmatpush3.bf16.msra.mxu0 %v5091_v44 }
 0x543   : > { %4416 = vmatprep.subr.bf16.mxu0 %v5923_v52 }
 0x546   : > { %4418 = vmatpush3.bf16.msra.mxu0 %v5103_v48  ;;  %v2092_v48 = vld [vmem:[%s5887_s3 + $0x18] sm:$0x3f] }
 0x547   : > { %4419 = vmatprep.subr.bf16.mxu0 %v5923_v52 }
 0x54a   : > { %4421 = vmatpush3.bf16.msra.mxu0 %v5113_v53 }
 0x54b   : > { %4422 = vmatprep.subr.bf16.mxu0 %v5923_v52 }
 0x54e   : > { %4424 = vmatpush3.bf16.msra.mxu0 %v5123_v56  ;;  %v4493_v56 = vpack.c.bf16 %v2092_v48, %v5262_v46 }
 0x54f   : > { %4425 = vmatprep.subr.bf16.mxu0 %v5923_v52 }
 0x552   : > { %4427 = vmatpush3.bf16.msra.mxu0 %v5133_v59  ;;  %v3026_v59 = vld [vmem:[%s5887_s3 + $0x58] sm:$0x3f] }
 0x553   : > { %4428 = vmatprep.subr.bf16.mxu0 %v5923_v52 }
 0x556   : > { %4430 = vmatpush3.bf16.msra.mxu0 %v5143_v63 }
 0x557   : > { %4431 = vmatprep.subr.bf16.mxu0 %v5923_v52 }
 0x55a   : > { %4433 = vmatpush3.bf16.msra.mxu0 %v5153_v4  ;;  %v4500_v4 = vpack.c.bf16 %v3026_v59, %v5306_v3 }
 0x55b   : > { %4458 = vmatprep.subr.bf16.mxu0 %v5923_v52 }
 0x5d0   : > { %v1560_v11 = vpop.f32.mrb[8].mxu0 }
 0x5d1   : > { %1565 = vst.msk [vmem:[%s5711_s29] sm:$0xf] %vm1564_vm9, %v1560_v11  ;;  %v3751_v17 = vpop.f32.mrb[9].mxu0 }
 0x5f0   : > { %v1649_v23 = vpop.f32.mrb[10].mxu0 }
 0x5f1   : > { %v3786_v29 = vpop.f32.mrb[11].mxu0  ;;  %3890 = vmatmul.mubr.f32.vlgmr.msra.gmra.mrb[12].mxu0 %v1649_v23 }
 0x5f2   : > { %4460 = vmatpush3.bf16.msra.mxu0 %v5163_v8  ;;  %3959 = vmatprep.mubr.msk.f32.mxu0 %vm4740_vm0, %v5922_v58 }
 0x5f3   : > { %4461 = vmatprep.subr.bf16.mxu0 %v5923_v52 }
 0x5f6   : > { %4463 = vmatpush3.bf16.msra.mxu0 %v5173_v14 }
 0x5f7   : > { %4464 = vmatprep.subr.bf16.mxu0 %v5923_v52 }
 0x5fa   : > { %4466 = vmatpush3.bf16.msra.mxu0 %v5185_v18 }
 0x5fb   : > { %4467 = vmatprep.subr.bf16.mxu0 %v5923_v52 }
 0x5fe   : > { %4469 = vmatpush3.bf16.msra.mxu0 %v5195_v21 }
 0x5ff   : > { %4470 = vmatprep.subr.bf16.mxu0 %v5923_v52 }
 0x602   : > { %4472 = vmatpush3.bf16.msra.mxu0 %v5205_v25 }
 0x603   : > { %4473 = vmatprep.subr.bf16.mxu0 %v5923_v52 }
 0x606   : > { %4475 = vmatpush3.bf16.msra.mxu0 %v5215_v28 }
 0x607   : > { %4476 = vmatprep.subr.bf16.mxu0 %v5923_v52 }
 0x60a   : > { %4478 = vmatpush3.bf16.msra.mxu0 %v5225_v32 }
 0x60b   : > { %4479 = vmatprep.subr.bf16.mxu0 %v5923_v52 }
 0x60e   : > { %4481 = vmatpush3.bf16.msra.mxu0 %v5235_v37 }
 0x60f   : > { %4533 = vmatprep.subr.bf16.mxu0 %v5923_v52 }
 0x611   : > { %3960 = vmatmul.mubr.f32.vlgmr.msra.gmra.mrb[12].mxu0 %v1993_v61 }
 0x612   : > { %4535 = vmatpush3.bf16.msra.mxu0 %v5343_v24  ;;  %4061 = vmatprep.mubr.msk.f32.mxu0 %vm4740_vm0, %v5922_v58  ;;  %v5925_v24 = vld [vmem:[#allocation13_spill] sm:$0xff] }
 0x613   : > { %4536 = vmatprep.subr.bf16.mxu0 %v5923_v52 }
 0x616   : > { %4538 = vmatpush3.bf16.msra.mxu0 %v5360_v34  ;;  %v5927_v34 = vld [vmem:[#allocation15_spill] sm:$0xff] }
 0x617   : > { %4539 = vmatprep.subr.bf16.mxu0 %v5923_v52 }
 0x61a   : > { %4541 = vmatpush3.bf16.msra.mxu0 %v5380_v47  ;;  %v5929_v47 = vld [vmem:[#allocation17_spill] sm:$0xff] }
 0x61b   : > { %4542 = vmatprep.subr.bf16.mxu0 %v5923_v52 }
 0x61e   : > { %4544 = vmatpush3.bf16.msra.mxu0 %v5400_v60 }
 0x61f   : > { %4545 = vmatprep.subr.bf16.mxu0 %v5923_v52 }
 0x622   : > { %4547 = vmatpush3.bf16.msra.mxu0 %v5424_v12 }
 0x623   : > { %4099 = vmatprep.subr.mxu0 %v5922_v58 }
 0x6e4   : > { %v2079_v39 = vpop.f32.mrb[12].mxu0 }
 0x6e5   : > { %2085 = vst.msk [vmem:[#allocation2 + $0x11] sm:$0xff] %vm874_vm5, %v2079_v39  ;;  %v3961_v44 = vpop.f32.mrb[13].mxu0 }
 0x6ec   : > { %v2093_v53 = vld [vmem:[#allocation2 + $0x11] sm:$0xff] }
 0x6ed   : > { %3971 = vmatmul.mubr.msk.f32.vlgmr.msra.gmra.mrb[18].mxu1 %vm874_vm5, %v2093_v53  ;;  %v2088_v63 = vld [vmem:[#allocation2 + $0x10] sm:$0xff] }
 0x6ee   : > { %4491 = vmatpush3.bf16.msra.mxu1 %v5248_v41  ;;  %3981 = vmatprep.mubr.msk.f32.mxu1 %vm4740_vm0, %v5922_v58  ;;  %v2250_v8 = vld [vmem:[#allocation2 + $0x12] sm:$0xff] }
 0x6ef   : > { %4492 = vmatprep.subr.bf16.mxu1 %v5923_v52 }
 0x6f2   : > { %4495 = vmatpush3.bf16.msk.msra.mxu1 %vm5278_vm4, %v4493_v56 }
 0x6f3   : > { %4496 = vmatprep.subr.bf16.mxu1 %v5923_v52 }
 0x6f5   : > { %3982 = vmatmul.mubr.msk.f32.vlgmr.msra.gmra.mrb[20].mxu1 %vm874_vm5, %v2088_v63 }
 0x6f6   : > { %4498 = vmatpush3.bf16.msra.mxu1 %v5301_v2  ;;  %3992 = vmatprep.mubr.msk.f32.mxu1 %vm4740_vm0, %v5922_v58 }
 0x6f7   : > { %4499 = vmatprep.subr.bf16.mxu1 %v5923_v52 }
 0x6fa   : > { %4502 = vmatpush3.bf16.msk.msra.mxu1 %vm5278_vm4, %v4500_v4 }
 0x6fb   : > { %4503 = vmatprep.subr.bf16.mxu1 %v5923_v52 }
 0x6fd   : > { %3993 = vmatmul.mubr.msk.f32.vlgmr.msra.gmra.mrb[22].mxu1 %vm874_vm5, %v2250_v8 }
 0x6fe   : > { %4505 = vmatpush3.bf16.msra.mxu1 %v5332_v16  ;;  %4015 = vmatprep.mubr.msk.f32.mxu1 %vm4740_vm0, %v5922_v58  ;;  %v5924_v16 = vld [vmem:[#allocation12_spill] sm:$0xff] }
 0x6ff   : > { %4506 = vmatprep.subr.bf16.mxu1 %v5923_v52 }
 0x702   : > { %4508 = vmatpush3.bf16.msra.mxu1 %v5349_v27  ;;  %v5926_v27 = vld [vmem:[#allocation14_spill] sm:$0xff] }
 0x703   : > { %4509 = vmatprep.subr.bf16.mxu1 %v5923_v52 }
 0x706   : > { %4511 = vmatpush3.bf16.msra.mxu1 %v5371_v40  ;;  %v5928_v40 = vld [vmem:[#allocation16_spill] sm:$0xff] }
 0x707   : > { %4512 = vmatprep.subr.bf16.mxu1 %v5923_v52 }
 0x70a   : > { %4514 = vmatpush3.bf16.msra.mxu1 %v5391_v55 }
 0x70b   : > { %4515 = vmatprep.subr.bf16.mxu1 %v5923_v52 }
 0x70e   : > { %4517 = vmatpush3.bf16.msra.mxu1 %v5414_v9 }
 0x70f   : > { %4518 = vmatprep.subr.bf16.mxu1 %v5923_v52 }
 0x7c0   : > { %v2170_v14 = vpop.f32.mrb[18].mxu1 }
 0x7c1   : > { %v3972_v18 = vpop.f32.mrb[19].mxu1 }
 0x7c8   : > { %v2246_v21 = vpop.f32.mrb[20].mxu1 }
 0x7c9   : > { %v2247_v25 = vadd.f32 %v2246_v21, %v2170_v14  ;;  %v3983_v28 = vpop.f32.mrb[21].mxu1 }
 0x7d0   : > { %v2327_v32 = vpop.f32.mrb[22].mxu1 }
 0x7d1   : > { %v2331_v37 = vadd.f32 %v2327_v32, %v2247_v25  ;;  %v3994_v41 = vpop.f32.mrb[23].mxu1 }
 0x7d3   : > { %v2339_v46 = vadd.f32 %v5433_v30, %v2331_v37 }
 0x7d5   : > { %v2340_v49 = vmax.f32 %v2339_v46, 0.0 }
 0x7d7   : > { %2342 = vst.msk [vmem:[#allocation3 + $0x11] sm:$0xff] %vm1135_vm7, %v2340_v49 }
 0x7de   : > { %v2356_v50 = vld [vmem:[#allocation3 + $0x11] sm:$0xff] }
 0x7df   : > { %v2513_v2 = vld [vmem:[#allocation3 + $0x12] sm:$0xff]  ;;  %4016 = vmatmul.mubr.msk.f32.vlgmr.msra.gmra.mrb[24].mxu1 %vm1135_vm7, %v2356_v50 }
 0x7e0   : > { %4062 = vmatmul.mubr.msk.f32.vlgmr.msra.gmra.mrb[14].mxu0 %vm1135_vm7, %v2513_v2  ;;  %4520 = vmatpush3.bf16.msra.mxu1 %v5443_v54  ;;  %v2345_v3 = vld [vmem:[#allocation3 + $0x10] sm:$0xff] }
 0x7e1   : > { %4038 = vmatprep.mubr.msk.f32.mxu1 %vm4740_vm0, %v5922_v58  ;;  %4521 = vmatprep.subr.bf16.mxu1 %v5923_v52 }
 0x7e2   : > { %4101 = vmatprep.mubr.msk.f32.mxu0 %vm4740_vm0, %v5922_v58 }
 0x7e4   : > { %4523 = vmatpush3.bf16.msra.mxu1 %v5454_v7 }
 0x7e5   : > { %4524 = vmatprep.subr.bf16.mxu1 %v5923_v52 }
 0x7e8   : > { %4526 = vmatpush3.bf16.msra.mxu1 %v5468_v15 }
 0x7e9   : > { %4527 = vmatprep.subr.bf16.mxu1 %v5923_v52 }
 0x7ec   : > { %4529 = vmatpush3.bf16.msra.mxu1 %v5478_v22  ;;  %v5930_v22 = vld [vmem:[#allocation18_spill] sm:$0xff] }
 0x7ed   : > { %4530 = vmatprep.subr.bf16.mxu1 %v5923_v52 }
 0x7f0   : > { %4532 = vmatpush3.bf16.msra.mxu1 %v5488_v35 }
 0x7f1   : > { %4548 = vmatprep.subr.bf16.mxu1 %v5923_v52 }
 0x7f3   : > { %4039 = vmatmul.mubr.msk.f32.vlgmr.msra.gmra.mrb[26].mxu1 %vm1135_vm7, %v2345_v3 }
 0x7f4   : > { %4550 = vmatpush3.bf16.msra.mxu1 %v5498_v43  ;;  %4096 = vmatprep.mubr.msk.f32.mxu1 %vm4740_vm0, %v5922_v58  ;;  %v2692_v43 = vld [vmem:[%s5892_s8] sm:$0xf] }
 0x7f5   : > { %4551 = vmatprep.subr.bf16.mxu1 %v5923_v52 }
 0x7f8   : > { %4553 = vmatpush3.bf16.msra.mxu1 %v5509_v62 }
 0x7f9   : > { %4554 = vmatprep.subr.bf16.mxu1 %v5923_v52 }
 0x7fc   : > { %4556 = vmatpush3.bf16.msra.mxu1 %v5924_v16 }
 0x7fd   : > { %4557 = vmatprep.subr.bf16.mxu1 %v5923_v52 }
 0x800   : > { %4559 = vmatpush3.bf16.msra.mxu1 %v5925_v24 }
 0x801   : > { %4560 = vmatprep.subr.bf16.mxu1 %v5923_v52 }
 0x804   : > { %4562 = vmatpush3.bf16.msra.mxu1 %v5926_v27 }
 0x805   : > { %4563 = vmatprep.subr.bf16.mxu1 %v5923_v52 }
 0x808   : > { %4565 = vmatpush3.bf16.msra.mxu1 %v5927_v34 }
 0x809   : > { %4566 = vmatprep.subr.bf16.mxu1 %v5923_v52 }
 0x80c   : > { %4568 = vmatpush3.bf16.msra.mxu1 %v5928_v40 }
 0x80d   : > { %4569 = vmatprep.subr.bf16.mxu1 %v5923_v52 }
 0x810   : > { %4571 = vmatpush3.bf16.msra.mxu1 %v5929_v47 }
 0x8b2   : > { %v2436_v55 = vpop.f32.mrb[24].mxu1 }
 0x8b3   : > { %v2593_v60 = vpop.f32.mrb[14].mxu0  ;;  %v4017_v9 = vpop.f32.mrb[25].mxu1 }
 0x8b4   : > { %v4063_v12 = vpop.f32.mrb[15].mxu0 }
 0x8c6   : > { %v2509_v30 = vpop.f32.mrb[26].mxu1 }
 0x8c7   : > { %v2510_v54 = vadd.f32 %v2509_v30, %v2436_v55  ;;  %v4040_v7 = vpop.f32.mrb[27].mxu1 }
 0x8c9   : > { %v2597_v15 = vadd.f32 %v2593_v60, %v2510_v54 }
 0x8cb   : > { %v2605_v35 = vadd.f32 %v5930_v22, %v2597_v15 }
 0x8cd   : > { %4097 = vmatmul.mubr.f32.vlgmr.msra.gmra.mrb[28].mxu1 %v2605_v35 }
 0x9a0   : > { %v2688_v62 = vpop.f32.mrb[28].mxu1 }
 0x9a1   : > { %v4098_v58 = vpop.f32.mrb[29].mxu1  ;;  %4100 = vmatpush3.msra.mxu0 %v2688_v62 }
 0x9a2   : > { %4102 = vmatmul.mubr.msk.f32.vlgmr.msra.gmra.mrb[16].mxu0 %vm1490_vm8, %v2692_v43 }
 0xa75   : > { %v2762_v52 = vpop.f32.mrb[16].mxu0 }
 0xa76   : > { %3055 = vst.msk [vmem:[%s5711_s29 + $0x4] sm:$0xf] %vm1564_vm9, %v2762_v52  ;;  %v4103_v20 = vpop.f32.mrb[17].mxu0 }
 0xa77   : > { %4681 = shalt.err (!%p4678_p2)
}
 0xa78   : > { %s4682_s29 = scalar_lea.hbm %s5838_s11, 128  ;;  %s4686_s28 = scalar_lea.hbm %s5893_s9, 256 }
 0xa79   : > { %p4683_p4 = scmp.ne.s32.totalorder %s5838_s11, %s4682_s29  ;;  %p4687_p9 = scmp.lt.u32.totalorder %s5838_s11, %s5893_s9 }
 0xa7a   : > { %p4688_p1 = scmp.lt.u32.totalorder %s4686_s28, %s4682_s29  ;;  %p4690_p6 = scmp.lt.u32.totalorder %s4682_s29, %s5838_s11 }
 0xa7b   : > { %p4684_p5 = pnand %p4683_p4, %p5931_p11 }
 0xa7c   : > { %p4689_p3 = por %p4688_p1, %p4687_p9 }
 0xa7d   : > { %p4685_p7 = pneg %p4684_p5 }
 0xa7e   : > { %p4691_p12 = por %p4690_p6, %p4689_p3 }
 0xa80   : > { %p4692_p13 = pnand %p4691_p12, %p4685_p7 }
 0xa82   : > { %4695 = shalt.err (!%p4692_p13)
}
 0xa83   : > { %s4744_s22 = smov 64   ;;  %s4745_s17 = smov 4  }
 0xa84   : > { %4585 = dma.vmem_to_hbm [thread:$0]  (%p5931_p11), %s5833_s14, 128, %s5838_s11, %s2769_s18, %s4744_s22, %s4744_s22, %s4745_s17  }
 0xa85 PF: > { %s2797_s13 = sand.u32 1, %s4722_s30   ;;  %p5932_p8 = scmp.ne.s32.totalorder %s5911_s21, 0 }
 0xa86   : > { %p5933_p10 = scmp.ge.s32.totalorder %s4734_s12, 2  ;;  %s2798_s25 = scalar_lea.sflag [#allocation6], %s2797_s13 }
 0xa88   : > { %p4592_p0 = pnand %p5933_p10, %p5932_p8 }
 0xa8a   : > { %4717 = dma.done.wait (!%p4592_p0), %s2798_s25, 128  }
 0xa8b   : > { %4719 = vsyncadd (!%p4592_p0), %s2798_s25, 4294967168  ;;  %s5934_s26 = sld [smem:[#allocation10_spill]]  ;;  %s5935_s11 = sld [smem:[#allocation11_spill]] }
 0xa8c   : > { %p22_p2 = scmp.ge.s32.totalorder %s4821_s15, 4   ;;  %s5936_s30 = smov %s4726_s10 }
 0xa8d   : > { %s5938_s12 = smov %s4821_s15 }
 0xa8e   :  { %24 = sbr.rel (!%p22_p2) target bundleno = 5 (0x5), region = 111 }
 0xa91   : > { %s5937_s10 = smov %s5934_s26 }
 0xa95   :  { %2803 = vsyncpa [#allocation5], 1 }
 0xa96   :  { %2805 = vsyncpa [#allocation5 + $0x1], 1 }
 0xa97   :  { %2806 = vsyncpa [#allocation6], 1 }
 0xa98   :  { %2808 = vsyncpa [#allocation6 + $0x1], 1 }

</bundles_post_ra>
